<compile_context>
chip_gen: v7x
topology: tpu7x:2x2x1
jax: 0.10.0
libtpu: 0.0.40
codegen_flags: <defaults>
</compile_context>

<pallas_src>
import jax
import jax.numpy as jnp
from jax.experimental import pallas as pl
from jax.experimental.pallas import tpu as pltpu

ENCODE_DIM = 512
HIDDEN_DIM = 256
ACTION_DIM = 7
HEAD_PAD = 128          # lane-dense width for the padded action head
SUBLANE = 8             # batch padded to a multiple of this


def _silu(x):
    # Kept in f32: EUP/VPU have huge slack here and v5e has no bf16 transcendentals.
    return x * jax.nn.sigmoid(x)


def gcbc_kernel(obs_ref, goal_ref,
                w_enc_a_ref, w_enc_b_ref, b_enc_ref,
                w1_ref, b1_ref, w2_ref, b2_ref, w3_ref, b3_ref,
                w4_ref, b4_ref,
                means_ref, acc_ref):
    """K-gridded encoder matmul + fused 3x(Linear+SiLU) MLP + padded action head.

    Grid axis 0 walks the (per-stream) flattened-image contraction dimension.
    acc_ref is a resident f32 VMEM accumulator; the MLP/head run on the last step.
    """
    k = pl.program_id(0)

    @pl.when(k == 0)
    def _():
        acc_ref[...] = jnp.zeros_like(acc_ref)

    # "encoder" Linear: split contraction == concat((obs, goal), dim=-3) @ w_enc
    acc_ref[...] += (
        jnp.dot(obs_ref[...], w_enc_a_ref[...], preferred_element_type=jnp.float32)
        + jnp.dot(goal_ref[...], w_enc_b_ref[...], preferred_element_type=jnp.float32))

    @pl.when(k == pl.num_programs(0) - 1)
    def _():
        h = acc_ref[...] + b_enc_ref[...]

        # mlp layer 1: Linear + Dropout(identity in eval) + SiLU
        # TODO(synk): training-mode dropout omitted (would need in-kernel PRNG).
        h = _silu(jnp.dot(h.astype(jnp.bfloat16), w1_ref[...],
                          preferred_element_type=jnp.float32) + b1_ref[...])
        # mlp layer 2
        h = _silu(jnp.dot(h.astype(jnp.bfloat16), w2_ref[...],
                          preferred_element_type=jnp.float32) + b2_ref[...])
        # mlp layer 3
        h = _silu(jnp.dot(h.astype(jnp.bfloat16), w3_ref[...],
                          preferred_element_type=jnp.float32) + b3_ref[...])

        # action_mean_linear, zero-padded to 128 lanes (cols >= ACTION_DIM are 0)
        means = jnp.dot(h.astype(jnp.bfloat16), w4_ref[...],
                        preferred_element_type=jnp.float32) + b4_ref[...]
        means_ref[...] = means.astype(means_ref.dtype)


def init_params(key, half_in_dim,
                encode_dim=ENCODE_DIM, hidden_dim=HIDDEN_DIM, action_dim=ACTION_DIM):
    """Synthetic params. Weights pre-transposed (in, out), stored bf16; biases f32.

    The encoder weight is stored as two halves (obs / goal) so the wrapper never
    has to materialize the channel-concat; the action head is zero-padded to 128.
    """
    ks = jax.random.split(key, 10)

    def lin(kw, kb, d_in, d_out):
        bound = 1.0 / jnp.sqrt(jnp.float32(d_in))
        w = jax.random.uniform(kw, (d_in, d_out), jnp.float32, -bound, bound)
        b = jax.random.uniform(kb, (1, d_out), jnp.float32, -bound, bound)
        return w, b

    flat_in_dim = 2 * half_in_dim
    w_enc, b_enc = lin(ks[0], ks[1], flat_in_dim, encode_dim)
    w1, b1 = lin(ks[2], ks[3], encode_dim, hidden_dim)
    w2, b2 = lin(ks[4], ks[5], hidden_dim, hidden_dim)
    w3, b3 = lin(ks[6], ks[7], hidden_dim, hidden_dim)
    w4, b4 = lin(ks[8], ks[9], hidden_dim, action_dim)

    bf16 = jnp.bfloat16
    w_enc_a = w_enc[:half_in_dim].astype(bf16)     # obs half of the contraction
    w_enc_b = w_enc[half_in_dim:].astype(bf16)     # goal half
    w4_pad = (jnp.zeros((hidden_dim, HEAD_PAD), jnp.float32)
              .at[:, :action_dim].set(w4).astype(bf16))
    b4_pad = jnp.zeros((1, HEAD_PAD), jnp.float32).at[:, :action_dim].set(b4)

    return (w_enc_a, w_enc_b, b_enc,
            w1.astype(bf16), b1,
            w2.astype(bf16), b2,
            w3.astype(bf16), b3,
            w4_pad, b4_pad)


def _pick_tk(half_in_dim, tk_max=512):
    """Largest 128-multiple divisor of half_in_dim that is <= tk_max.

    Falls back to the full contraction dim (single K step, whole weight half
    resident) if no such divisor exists — always satisfies the (8,128) rule.
    """
    if half_in_dim <= tk_max:
        return half_in_dim
    t = (tk_max // 128) * 128
    while t >= 128:
        if half_in_dim % t == 0:
            return t
        t -= 128
    return half_in_dim


def gcbc_forward(obs_imgs, goal_imgs, params, *, tk_max=512):
    """Equivalent of GCBCAgent.forward (eval mode, no augmentation).

    Returns (means, fixed_std) — the parameters of MultivariateNormal(means, scale_tril=I).
    """
    (w_enc_a, w_enc_b, b_enc, w1, b1, w2, b2, w3, b3, w4, b4) = params
    B = obs_imgs.shape[0]
    half_in_dim = w_enc_a.shape[0]

    # Flatten each stream separately (no channel-concat copy) and ship in bf16.
    obs_flat = obs_imgs.reshape(B, -1).astype(jnp.bfloat16)
    goal_flat = goal_imgs.reshape(B, -1).astype(jnp.bfloat16)

    # Pad batch to a sublane multiple so activation tiles aren't mostly empty.
    B_pad = max(SUBLANE, ((B + SUBLANE - 1) // SUBLANE) * SUBLANE)
    if B_pad != B:
        pad = ((0, B_pad - B), (0, 0))
        obs_flat = jnp.pad(obs_flat, pad)
        goal_flat = jnp.pad(goal_flat, pad)

    # K tile: chosen so 2 streams x 2 buffers x (B_pad*tk + tk*ENCODE_DIM) bf16
    # stays far under the 32 MiB scoped-VMEM budget (v7x-safe; fine on v5e/v6e).
    tk = _pick_tk(half_in_dim, tk_max)
    n_k = half_in_dim // tk

    def full(shape):
        return pl.BlockSpec(shape, lambda k: (0, 0))

    grid_spec = pltpu.PrefetchScalarGridSpec(
        num_scalar_prefetch=0,
        grid=(n_k,),
        in_specs=[
            pl.BlockSpec((B_pad, tk), lambda k: (0, k)),        # obs_flat
            pl.BlockSpec((B_pad, tk), lambda k: (0, k)),        # goal_flat
            pl.BlockSpec((tk, ENCODE_DIM), lambda k: (k, 0)),   # w_enc_a (streamed)
            pl.BlockSpec((tk, ENCODE_DIM), lambda k: (k, 0)),   # w_enc_b (streamed)
            full(b_enc.shape),
            full(w1.shape), full(b1.shape),
            full(w2.shape), full(b2.shape),
            full(w3.shape), full(b3.shape),
            full(w4.shape), full(b4.shape),
        ],
        out_specs=pl.BlockSpec((B_pad, HEAD_PAD), lambda k: (0, 0)),
        scratch_shapes=[pltpu.VMEM((B_pad, ENCODE_DIM), jnp.float32)],
    )

    flops = 2 * B_pad * (2 * half_in_dim * ENCODE_DIM
                         + ENCODE_DIM * HIDDEN_DIM
                         + 2 * HIDDEN_DIM * HIDDEN_DIM
                         + HIDDEN_DIM * HEAD_PAD)
    transcendentals = 3 * B_pad * HIDDEN_DIM
    bytes_accessed = (sum(int(p.size) * p.dtype.itemsize for p in params)
                      + int(obs_flat.size) * 2 + int(goal_flat.size) * 2
                      + B_pad * HEAD_PAD * 4)

    means_pad = pl.pallas_call(
        gcbc_kernel,
        out_shape=jax.ShapeDtypeStruct((B_pad, HEAD_PAD), jnp.float32),
        grid_spec=grid_spec,
        compiler_params=pltpu.CompilerParams(
            dimension_semantics=("arbitrary",),          # K is a reduction axis
            vmem_limit_bytes=32 * 1024 * 1024,           # v7x scoped-VMEM safe
        ),
        cost_estimate=pl.CostEstimate(
            flops=flops,
            transcendentals=transcendentals,
            bytes_accessed=bytes_accessed),
    )(obs_flat, goal_flat, w_enc_a, w_enc_b, b_enc,
      w1, b1, w2, b2, w3, b3, w4, b4)

    means = means_pad[:B, :ACTION_DIM]
    fixed_std = jnp.eye(ACTION_DIM, dtype=jnp.float32)   # MVN scale_tril buffer
    return means, fixed_std


def gcbc_reference(obs_imgs, goal_imgs, params):
    """Pure-JAX reference with kernel-matching numerics (bf16 operands, f32 accum)."""
    (w_enc_a, w_enc_b, b_enc, w1, b1, w2, b2, w3, b3, w4, b4) = params
    B = obs_imgs.shape[0]
    obs = obs_imgs.reshape(B, -1).astype(jnp.bfloat16)
    goal = goal_imgs.reshape(B, -1).astype(jnp.bfloat16)

    def dot(a, b):
        return jnp.dot(a, b, preferred_element_type=jnp.float32)

    h = dot(obs, w_enc_a) + dot(goal, w_enc_b) + b_enc
    h = _silu(dot(h.astype(jnp.bfloat16), w1) + b1)
    h = _silu(dot(h.astype(jnp.bfloat16), w2) + b2)
    h = _silu(dot(h.astype(jnp.bfloat16), w3) + b3)
    means = dot(h.astype(jnp.bfloat16), w4) + b4
    return means[:, :ACTION_DIM]


if __name__ == "__main__":
    key = jax.random.PRNGKey(0)
    k_obs, k_goal, k_par = jax.random.split(key, 3)

    B, C, H, W = 2, 4, 16, 16  # NCHW
    obs_imgs = jax.random.normal(k_obs, (B, C, H, W), jnp.float32)
    goal_imgs = jax.random.normal(k_goal, (B, C, H, W), jnp.float32)

    half_in_dim = C * H * W            # per-stream flattened dim (concat handled in-kernel)
    params = init_params(k_par, half_in_dim)

    forward = jax.jit(gcbc_forward)    # fuse flatten/pad/cast plumbing with the call
    means, fixed_std = forward(obs_imgs, goal_imgs, params)
    jax.block_until_ready(means)
    jax.block_until_ready(fixed_std)

    ref = gcbc_reference(obs_imgs, goal_imgs, params)
    assert means.shape == (B, ACTION_DIM)
    assert fixed_std.shape == (ACTION_DIM, ACTION_DIM)
    assert jnp.allclose(means, ref, atol=1e-2, rtol=1e-2), (
        float(jnp.max(jnp.abs(means - ref))))

    print("KERNEL_OK")
</pallas_src>

<mosaic_0001>
module attributes {stable_mosaic.version = 11 : i64} {
  func.func @gcbc_kernel(%arg0: i32, %arg1: memref<8x512xbf16, #tpu.memory_space<vmem>>, %arg2: memref<8x512xbf16, #tpu.memory_space<vmem>>, %arg3: memref<512x512xbf16, #tpu.memory_space<vmem>>, %arg4: memref<512x512xbf16, #tpu.memory_space<vmem>>, %arg5: memref<1x512xf32, #tpu.memory_space<vmem>>, %arg6: memref<512x256xbf16, #tpu.memory_space<vmem>>, %arg7: memref<1x256xf32, #tpu.memory_space<vmem>>, %arg8: memref<256x256xbf16, #tpu.memory_space<vmem>>, %arg9: memref<1x256xf32, #tpu.memory_space<vmem>>, %arg10: memref<256x256xbf16, #tpu.memory_space<vmem>>, %arg11: memref<1x256xf32, #tpu.memory_space<vmem>>, %arg12: memref<256x128xbf16, #tpu.memory_space<vmem>>, %arg13: memref<1x128xf32, #tpu.memory_space<vmem>>, %arg14: memref<8x128xf32, #tpu.memory_space<vmem>>, %arg15: memref<8x512xf32, #tpu.memory_space<vmem>>) attributes {dimension_semantics = [#tpu.dimension_semantics<arbitrary>], iteration_bounds = array<i64: 2>, scalar_prefetch = 0 : i64, scratch_operands = 1 : i64, tpu.core_type = #tpu.core_type<tc>, window_params = [{transform_indices = @transform_0, window_bounds = array<i64: 8, 512>}, {transform_indices = @transform_1, window_bounds = array<i64: 8, 512>}, {transform_indices = @transform_2, window_bounds = array<i64: 512, 512>}, {transform_indices = @transform_3, window_bounds = array<i64: 512, 512>}, {pipeline_mode = #tpu.pipeline_mode<synchronous>, transform_indices = @transform_4, window_bounds = array<i64: 1, 512>}, {pipeline_mode = #tpu.pipeline_mode<synchronous>, transform_indices = @transform_5, window_bounds = array<i64: 512, 256>}, {pipeline_mode = #tpu.pipeline_mode<synchronous>, transform_indices = @transform_6, window_bounds = array<i64: 1, 256>}, {pipeline_mode = #tpu.pipeline_mode<synchronous>, transform_indices = @transform_7, window_bounds = array<i64: 256, 256>}, {pipeline_mode = #tpu.pipeline_mode<synchronous>, transform_indices = @transform_8, window_bounds = array<i64: 1, 256>}, {pipeline_mode = #tpu.pipeline_mode<synchronous>, transform_indices = @transform_9, window_bounds = array<i64: 256, 256>}, {pipeline_mode = #tpu.pipeline_mode<synchronous>, transform_indices = @transform_10, window_bounds = array<i64: 1, 256>}, {pipeline_mode = #tpu.pipeline_mode<synchronous>, transform_indices = @transform_11, window_bounds = array<i64: 256, 128>}, {pipeline_mode = #tpu.pipeline_mode<synchronous>, transform_indices = @transform_12, window_bounds = array<i64: 1, 128>}, {pipeline_mode = #tpu.pipeline_mode<synchronous>, transform_indices = @transform_13, window_bounds = array<i64: 8, 128>}]} {
    %c0_i32 = arith.constant 0 : i32
    %0 = arith.cmpi eq, %arg0, %c0_i32 : i32
    %1 = arith.extui %0 : i1 to i32
    %c0_i32_0 = arith.constant 0 : i32
    %2 = arith.cmpi ne, %1, %c0_i32_0 : i32
    scf.if %2 {
      %cst_14 = arith.constant 0.000000e+00 : f32
      %16 = vector.broadcast %cst_14 : f32 to vector<8x512xf32>
      %c0_15 = arith.constant 0 : index
      %c0_16 = arith.constant 0 : index
      %17 = vector.load %arg15[%c0_15, %c0_16] : memref<8x512xf32, #tpu.memory_space<vmem>>, vector<8x512xf32>
      tpu.vector_store %arg15[%c0_15, %c0_16], %16 {strides = array<i32>} : memref<8x512xf32, #tpu.memory_space<vmem>>, vector<8x512xf32>,
    } else {
    }
    %c0 = arith.constant 0 : index
    %c0_1 = arith.constant 0 : index
    %3 = vector.load %arg15[%c0, %c0_1] : memref<8x512xf32, #tpu.memory_space<vmem>>, vector<8x512xf32>
    %c0_2 = arith.constant 0 : index
    %c0_3 = arith.constant 0 : index
    %4 = vector.load %arg1[%c0_2, %c0_3] : memref<8x512xbf16, #tpu.memory_space<vmem>>, vector<8x512xbf16>
    %c0_4 = arith.constant 0 : index
    %c0_5 = arith.constant 0 : index
    %5 = vector.load %arg3[%c0_4, %c0_5] : memref<512x512xbf16, #tpu.memory_space<vmem>>, vector<512x512xbf16>
    %cst = arith.constant dense<0.000000e+00> : vector<8x512xf32>
    %6 = tpu.matmul %4, %5, %cst {dimension_numbers = #tpu.dot_dimension_numbers<[1], [0], [0], [1], [0, 0, 1, 1], [], []>} : vector<8x512xbf16>, vector<512x512xbf16>, vector<8x512xf32> -> vector<8x512xf32>
    %c0_6 = arith.constant 0 : index
    %c0_7 = arith.constant 0 : index
    %7 = vector.load %arg2[%c0_6, %c0_7] : memref<8x512xbf16, #tpu.memory_space<vmem>>, vector<8x512xbf16>
    %c0_8 = arith.constant 0 : index
    %c0_9 = arith.constant 0 : index
    %8 = vector.load %arg4[%c0_8, %c0_9] : memref<512x512xbf16, #tpu.memory_space<vmem>>, vector<512x512xbf16>
    %cst_10 = arith.constant dense<0.000000e+00> : vector<8x512xf32>
    %9 = tpu.matmul %7, %8, %cst_10 {dimension_numbers = #tpu.dot_dimension_numbers<[1], [0], [0], [1], [0, 0, 1, 1], [], []>} : vector<8x512xbf16>, vector<512x512xbf16>, vector<8x512xf32> -> vector<8x512xf32>
    %10 = arith.addf %6, %9 : vector<8x512xf32>
    %11 = arith.addf %3, %10 : vector<8x512xf32>
    %c0_11 = arith.constant 0 : index
    %c0_12 = arith.constant 0 : index
    %12 = vector.load %arg15[%c0_11, %c0_12] : memref<8x512xf32, #tpu.memory_space<vmem>>, vector<8x512xf32>
    tpu.vector_store %arg15[%c0_11, %c0_12], %11 {strides = array<i32>} : memref<8x512xf32, #tpu.memory_space<vmem>>, vector<8x512xf32>,
    %c1_i32 = arith.constant 1 : i32
    %13 = arith.cmpi eq, %arg0, %c1_i32 : i32
    %14 = arith.extui %13 : i1 to i32
    %c0_i32_13 = arith.constant 0 : i32
    %15 = arith.cmpi ne, %14, %c0_i32_13 : i32
    scf.if %15 {
      %c0_14 = arith.constant 0 : index
      %c0_15 = arith.constant 0 : index
      %16 = vector.load %arg15[%c0_14, %c0_15] : memref<8x512xf32, #tpu.memory_space<vmem>>, vector<8x512xf32>
      %c0_16 = arith.constant 0 : index
      %c0_17 = arith.constant 0 : index
      %17 = vector.load %arg5[%c0_16, %c0_17] : memref<1x512xf32, #tpu.memory_space<vmem>>, vector<1x512xf32>
      %18 = vector.broadcast %17 : vector<1x512xf32> to vector<8x512xf32>
      %19 = arith.addf %16, %18 : vector<8x512xf32>
      %20 = arith.truncf %19 : vector<8x512xf32> to vector<8x512xbf16>
      %c0_18 = arith.constant 0 : index
      %c0_19 = arith.constant 0 : index
      %21 = vector.load %arg6[%c0_18, %c0_19] : memref<512x256xbf16, #tpu.memory_space<vmem>>, vector<512x256xbf16>
      %cst_20 = arith.constant dense<0.000000e+00> : vector<8x256xf32>
      %22 = tpu.matmul %20, %21, %cst_20 {dimension_numbers = #tpu.dot_dimension_numbers<[1], [0], [0], [1], [0, 0, 1, 1], [], []>} : vector<8x512xbf16>, vector<512x256xbf16>, vector<8x256xf32> -> vector<8x256xf32>
      %c0_21 = arith.constant 0 : index
      %c0_22 = arith.constant 0 : index
      %23 = vector.load %arg7[%c0_21, %c0_22] : memref<1x256xf32, #tpu.memory_space<vmem>>, vector<1x256xf32>
      %24 = vector.broadcast %23 : vector<1x256xf32> to vector<8x256xf32>
      %25 = arith.addf %22, %24 : vector<8x256xf32>
      %26 = arith.negf %25 : vector<8x256xf32>
      %27 = math.exp %26 : vector<8x256xf32>
      %cst_23 = arith.constant 1.000000e+00 : f32
      %28 = vector.broadcast %cst_23 : f32 to vector<8x256xf32>
      %29 = arith.addf %28, %27 : vector<8x256xf32>
      %30 = arith.divf %28, %29 : vector<8x256xf32>
      %31 = arith.mulf %25, %30 : vector<8x256xf32>
      %32 = arith.truncf %31 : vector<8x256xf32> to vector<8x256xbf16>
      %c0_24 = arith.constant 0 : index
      %c0_25 = arith.constant 0 : index
      %33 = vector.load %arg8[%c0_24, %c0_25] : memref<256x256xbf16, #tpu.memory_space<vmem>>, vector<256x256xbf16>
      %cst_26 = arith.constant dense<0.000000e+00> : vector<8x256xf32>
      %34 = tpu.matmul %32, %33, %cst_26 {dimension_numbers = #tpu.dot_dimension_numbers<[1], [0], [0], [1], [0, 0, 1, 1], [], []>} : vector<8x256xbf16>, vector<256x256xbf16>, vector<8x256xf32> -> vector<8x256xf32>
      %c0_27 = arith.constant 0 : index
      %c0_28 = arith.constant 0 : index
      %35 = vector.load %arg9[%c0_27, %c0_28] : memref<1x256xf32, #tpu.memory_space<vmem>>, vector<1x256xf32>
      %36 = vector.broadcast %35 : vector<1x256xf32> to vector<8x256xf32>
      %37 = arith.addf %34, %36 : vector<8x256xf32>
      %38 = arith.negf %37 : vector<8x256xf32>
      %39 = math.exp %38 : vector<8x256xf32>
      %cst_29 = arith.constant 1.000000e+00 : f32
      %40 = vector.broadcast %cst_29 : f32 to vector<8x256xf32>
      %41 = arith.addf %40, %39 : vector<8x256xf32>
      %42 = arith.divf %40, %41 : vector<8x256xf32>
      %43 = arith.mulf %37, %42 : vector<8x256xf32>
      %44 = arith.truncf %43 : vector<8x256xf32> to vector<8x256xbf16>
      %c0_30 = arith.constant 0 : index
      %c0_31 = arith.constant 0 : index
      %45 = vector.load %arg10[%c0_30, %c0_31] : memref<256x256xbf16, #tpu.memory_space<vmem>>, vector<256x256xbf16>
      %cst_32 = arith.constant dense<0.000000e+00> : vector<8x256xf32>
      %46 = tpu.matmul %44, %45, %cst_32 {dimension_numbers = #tpu.dot_dimension_numbers<[1], [0], [0], [1], [0, 0, 1, 1], [], []>} : vector<8x256xbf16>, vector<256x256xbf16>, vector<8x256xf32> -> vector<8x256xf32>
      %c0_33 = arith.constant 0 : index
      %c0_34 = arith.constant 0 : index
      %47 = vector.load %arg11[%c0_33, %c0_34] : memref<1x256xf32, #tpu.memory_space<vmem>>, vector<1x256xf32>
      %48 = vector.broadcast %47 : vector<1x256xf32> to vector<8x256xf32>
      %49 = arith.addf %46, %48 : vector<8x256xf32>
      %50 = arith.negf %49 : vector<8x256xf32>
      %51 = math.exp %50 : vector<8x256xf32>
      %cst_35 = arith.constant 1.000000e+00 : f32
      %52 = vector.broadcast %cst_35 : f32 to vector<8x256xf32>
      %53 = arith.addf %52, %51 : vector<8x256xf32>
      %54 = arith.divf %52, %53 : vector<8x256xf32>
      %55 = arith.mulf %49, %54 : vector<8x256xf32>
      %56 = arith.truncf %55 : vector<8x256xf32> to vector<8x256xbf16>
      %c0_36 = arith.constant 0 : index
      %c0_37 = arith.constant 0 : index
      %57 = vector.load %arg12[%c0_36, %c0_37] : memref<256x128xbf16, #tpu.memory_space<vmem>>, vector<256x128xbf16>
      %cst_38 = arith.constant dense<0.000000e+00> : vector<8x128xf32>
      %58 = tpu.matmul %56, %57, %cst_38 {dimension_numbers = #tpu.dot_dimension_numbers<[1], [0], [0], [1], [0, 0, 1, 1], [], []>} : vector<8x256xbf16>, vector<256x128xbf16>, vector<8x128xf32> -> vector<8x128xf32>
      %c0_39 = arith.constant 0 : index
      %c0_40 = arith.constant 0 : index
      %59 = vector.load %arg13[%c0_39, %c0_40] : memref<1x128xf32, #tpu.memory_space<vmem>>, vector<1x128xf32>
      %60 = vector.broadcast %59 : vector<1x128xf32> to vector<8x128xf32>
      %61 = arith.addf %58, %60 : vector<8x128xf32>
      %c0_41 = arith.constant 0 : index
      %c0_42 = arith.constant 0 : index
      %62 = vector.load %arg14[%c0_41, %c0_42] : memref<8x128xf32, #tpu.memory_space<vmem>>, vector<8x128xf32>
      tpu.vector_store %arg14[%c0_41, %c0_42], %61 {strides = array<i32>} : memref<8x128xf32, #tpu.memory_space<vmem>>, vector<8x128xf32>,
    } else {
    }
    return
  }
  func.func @transform_0(%arg0: i32) -> (i32, i32) {
    %c0_i32 = arith.constant 0 : i32
    %c0_i32_0 = arith.constant 0 : i32
    return %c0_i32, %arg0 : i32, i32
  }
  func.func @transform_1(%arg0: i32) -> (i32, i32) {
    %c0_i32 = arith.constant 0 : i32
    %c0_i32_0 = arith.constant 0 : i32
    return %c0_i32, %arg0 : i32, i32
  }
  func.func @transform_2(%arg0: i32) -> (i32, i32) {
    %c0_i32 = arith.constant 0 : i32
    %c0_i32_0 = arith.constant 0 : i32
    return %arg0, %c0_i32 : i32, i32
  }
  func.func @transform_3(%arg0: i32) -> (i32, i32) {
    %c0_i32 = arith.constant 0 : i32
    %c0_i32_0 = arith.constant 0 : i32
    return %arg0, %c0_i32 : i32, i32
  }
  func.func @transform_4(%arg0: i32) -> (i32, i32) {
    %c0_i32 = arith.constant 0 : i32
    %c0_i32_0 = arith.constant 0 : i32
    %c0_i32_1 = arith.constant 0 : i32
    return %c0_i32, %c0_i32_0 : i32, i32
  }
  func.func @transform_5(%arg0: i32) -> (i32, i32) {
    %c0_i32 = arith.constant 0 : i32
    %c0_i32_0 = arith.constant 0 : i32
    %c0_i32_1 = arith.constant 0 : i32
    return %c0_i32, %c0_i32_0 : i32, i32
  }
  func.func @transform_6(%arg0: i32) -> (i32, i32) {
    %c0_i32 = arith.constant 0 : i32
    %c0_i32_0 = arith.constant 0 : i32
    %c0_i32_1 = arith.constant 0 : i32
    return %c0_i32, %c0_i32_0 : i32, i32
  }
  func.func @transform_7(%arg0: i32) -> (i32, i32) {
    %c0_i32 = arith.constant 0 : i32
    %c0_i32_0 = arith.constant 0 : i32
    %c0_i32_1 = arith.constant 0 : i32
    return %c0_i32, %c0_i32_0 : i32, i32
  }
  func.func @transform_8(%arg0: i32) -> (i32, i32) {
    %c0_i32 = arith.constant 0 : i32
    %c0_i32_0 = arith.constant 0 : i32
    %c0_i32_1 = arith.constant 0 : i32
    return %c0_i32, %c0_i32_0 : i32, i32
  }
  func.func @transform_9(%arg0: i32) -> (i32, i32) {
    %c0_i32 = arith.constant 0 : i32
    %c0_i32_0 = arith.constant 0 : i32
    %c0_i32_1 = arith.constant 0 : i32
    return %c0_i32, %c0_i32_0 : i32, i32
  }
  func.func @transform_10(%arg0: i32) -> (i32, i32) {
    %c0_i32 = arith.constant 0 : i32
    %c0_i32_0 = arith.constant 0 : i32
    %c0_i32_1 = arith.constant 0 : i32
    return %c0_i32, %c0_i32_0 : i32, i32
  }
  func.func @transform_11(%arg0: i32) -> (i32, i32) {
    %c0_i32 = arith.constant 0 : i32
    %c0_i32_0 = arith.constant 0 : i32
    %c0_i32_1 = arith.constant 0 : i32
    return %c0_i32, %c0_i32_0 : i32, i32
  }
  func.func @transform_12(%arg0: i32) -> (i32, i32) {
    %c0_i32 = arith.constant 0 : i32
    %c0_i32_0 = arith.constant 0 : i32
    %c0_i32_1 = arith.constant 0 : i32
    return %c0_i32, %c0_i32_0 : i32, i32
  }
  func.func @transform_13(%arg0: i32) -> (i32, i32) {
    %c0_i32 = arith.constant 0 : i32
    %c0_i32_0 = arith.constant 0 : i32
    %c0_i32_1 = arith.constant 0 : i32
    return %c0_i32, %c0_i32_0 : i32, i32
  }
}

</mosaic_0001>

<bundles_post_ra>
// kernel: gcbc_forward.1
= control target key start
LH: loop header
LB: loop body
LE: loop exit
PB: predicated region body
PF: predicated region fallthrough
CT: control target
= control target key end

     0   :  { %s6529_s0 = inlined_call_operand.vmem [shape: bf16[8,1024], index: 0, kind: input, shape index: {}]   ;;  %s6530_s1 = inlined_call_operand.vmem [shape: bf16[8,1024], index: 1, kind: input, shape index: {}]   ;;  %s6531_s2 = inlined_call_operand.hbm [shape: bf16[1024,512], index: 2, kind: input, shape index: {}]   ;;  %s6532_s3 = inlined_call_operand.hbm [shape: bf16[1024,512], index: 3, kind: input, shape index: {}]   ;;  %s6533_s4 = inlined_call_operand.hbm [shape: f32[1,512], index: 4, kind: input, shape index: {}]   ;;  %s6534_s5 = inlined_call_operand.vmem [shape: bf16[512,256], index: 5, kind: input, shape index: {}]   ;;  %s6535_s6 = inlined_call_operand.hbm [shape: f32[1,256], index: 6, kind: input, shape index: {}]   ;;  %s6536_s7 = inlined_call_operand.hbm [shape: bf16[256,256], index: 7, kind: input, shape index: {}]   ;;  %s6537_s8 = inlined_call_operand.hbm [shape: f32[1,256], index: 8, kind: input, shape index: {}]   ;;  %s6538_s9 = inlined_call_operand.hbm [shape: bf16[256,256], index: 9, kind: input, shape index: {}]   ;;  %s6539_s10 = inlined_call_operand.hbm [shape: f32[1,256], index: 10, kind: input, shape index: {}]   ;;  %s6540_s11 = inlined_call_operand.hbm [shape: bf16[256,128], index: 11, kind: input, shape index: {}]   ;;  %s6541_s12 = inlined_call_operand.hbm [shape: f32[1,128], index: 12, kind: input, shape index: {}]   ;;  %s6542_s13 = inlined_call_operand.vmem [shape: f32[8,128], index: 13, kind: output, shape index: {}]  }
   0x1   :  { %6546 = sst [smem:[#allocation26_spill]] %s6529_s0 }
   0x2   :  { %6547 = sst [smem:[#allocation27_spill]] %s6530_s1 }
   0x3   :  { %6548 = sst [smem:[#allocation28_spill]] %s6533_s4 }
   0x4   :  { %6549 = sst [smem:[#allocation29_spill]] %s6534_s5 }
   0x5   :  { %6550 = sst [smem:[#allocation30_spill]] %s6535_s6 }
   0x6   :  { %6551 = sst [smem:[#allocation31_spill]] %s6537_s8 }
   0x7   :  { %6552 = sst [smem:[#allocation32_spill]] %s6542_s13 }
   0x8   :  { %18 = vsyncpa [#allocation4], 0 }
   0x9   :  { %20 = vsyncpa [#allocation4 + $0x1], 0 }
   0xa   :  { %21 = vsyncpa [#allocation6], 0 }
   0xb   :  { %23 = vsyncpa [#allocation6 + $0x1], 0 }
   0xc   :  { %24 = vsyncpa [#allocation9], 0 }
   0xd   :  { %25 = vsyncpa [#allocation12], 0 }
   0xe   :  { %26 = vsyncpa [#allocation15], 0 }
   0xf   :  { %27 = vsyncpa [#allocation18], 0  ;;  %s5621_s25 = smov 0   ;;  %s5623_s26 = smov 0  }
  0x10   :  { %s5625_s27 = smov 0   ;;  %s5627_s28 = smov 0  }
  0x11 LB: > { %s5534_s29 = smov [#allocation7]   ;;  %s5642_s14 = sadd.s32 4294967295, %s5532_s28   ;;  %s5532_s28 = sphi %s5627_s28, %s6581_s28   ;;  %s5528_s27 = sphi %s5625_s27, %s6580_s27   ;;  %s5524_s26 = sphi %s5623_s26, %s6579_s26   ;;  %s5520_s25 = sphi %s5621_s25, %s6578_s25  }
  0x12   : > { %s365_s30 = sshll.u32 %s5534_s29, 4  ;;  %p3950_p0 = scmp.ge.s32.totalorder %s5532_s28, 1  ;;  %s5648_s30 = int_to_ptr.vmem [resolvable:$true] %s365_s30 }
  0x13   : > { %p6544_p1 = scmp.eq.s32.totalorder %s5642_s14, 0  ;;  %p352_p2 = scmp.lt.s32.totalorder %s5532_s28, 3 }
  0x14   : > { %s5535_s16 = smov [#allocation8]   ;;  %s5536_s18 = smov [#allocation11]  }
  0x15   : > { %p5650_p4 = pnand %p3950_p0, %p352_p2  ;;  %s379_s17 = sshll.u32 %s5535_s16, 4  ;;  %s5656_s17 = int_to_ptr.vmem [resolvable:$true] %s379_s17 }
  0x16   : > { %s403_s19 = sshll.u32 %s5536_s18, 4  ;;  %s5537_s21 = smov [#allocation14]   ;;  %s5664_s19 = int_to_ptr.vmem [resolvable:$true] %s403_s19 }
  0x17   : > { %s6553_s15 = scalar_select %p5650_p4, 1, 0 }
  0x18   : > { %p4470_p5 = pneg %p5650_p4  ;;  %s5666_s22 = sshll.u32 %s5537_s21, 4  ;;  %s428_s22 = int_to_ptr.vmem [resolvable:$true] %s5666_s22 }
  0x19   : > { %s6555_s4 = sld [smem:[#allocation28_spill]] }
  0x1a   : > { %p5660_p6 = pnand %p4470_p5, %p6544_p1 }
  0x1c   : > { %p5676_p8 = pneg %p5660_p6 }
  0x1f   : > { %s5190_s29 = scalar_lea.hbm %s6555_s4, 64 }
  0x20   : > { %p5191_p7 = scmp.ne.s32.totalorder %s6555_s4, %s5190_s29  ;;  %p5197_p11 = scmp.lt.u32.totalorder %s5190_s29, %s6555_s4 }
  0x22   : > { %p5193_p9 = pnand %p5676_p8, %p5191_p7 }
  0x24   : > { %p5194_p10 = pneg %p5193_p9 }
  0x26   : > { %p5199_p12 = pnand %p5197_p11, %p5194_p10 }
  0x28   : > { %5202 = shalt.err (!%p5199_p12)
}
  0x29   : > { %s5203_s13 = scalar_lea.vmem %s5648_s30, 64  ;;  %p5211_p5 = scmp.lt.s32.totalorder %s5648_s30, %s5648_s30 }
  0x2a   : > { %p5204_p13 = scmp.ne.s32.totalorder %s5648_s30, %s5203_s13  ;;  %p5212_p3 = scmp.lt.s32.totalorder %s5203_s13, %s5203_s13 }
  0x2c   : > { %p5206_p0 = pnand %p5204_p13, %p5676_p8  ;;  %p5213_p7 = por %p5212_p3, %p5211_p5 }
  0x2e   : > { %p5207_p2 = pneg %p5206_p0 }
  0x30   : > { %p5214_p9 = pnand %p5213_p7, %p5207_p2 }
  0x32   : > { %5217 = shalt.err (!%p5214_p9)
}
  0x33   : > { %4473 = dma.hbm_to_vmem [thread:$0]  (!%p5660_p6), %s6555_s4, 64, %s5648_s30, [#allocation6]  }
  0x34   : > { %s6557_s6 = sld [smem:[#allocation30_spill]] }
  0x3a   : > { %s5218_s16 = scalar_lea.hbm %s6557_s6, 32 }
  0x3b   : > { %p5219_p10 = scmp.ne.s32.totalorder %s6557_s6, %s5218_s16  ;;  %p5225_p12 = scmp.lt.u32.totalorder %s5218_s16, %s6557_s6 }
  0x3d   : > { %p5221_p3 = pnand %p5219_p10, %p5676_p8 }
  0x3f   : > { %p5222_p11 = pneg %p5221_p3 }
  0x41   : > { %p5227_p13 = pnand %p5225_p12, %p5222_p11 }
  0x43   : > { %5230 = shalt.err (!%p5227_p13)
}
  0x44   : > { %s5231_s30 = scalar_lea.vmem %s5656_s17, 32  ;;  %p5239_p7 = scmp.lt.s32.totalorder %s5656_s17, %s5656_s17 }
  0x45   : > { %p5232_p0 = scmp.ne.s32.totalorder %s5656_s17, %s5231_s30  ;;  %p5240_p9 = scmp.lt.s32.totalorder %s5231_s30, %s5231_s30 }
  0x47   : > { %p5234_p2 = pnand %p5232_p0, %p5676_p8  ;;  %p5241_p10 = por %p5240_p9, %p5239_p7 }
  0x49   : > { %p5235_p5 = pneg %p5234_p2 }
  0x4b   : > { %p5242_p3 = pnand %p5241_p10, %p5235_p5 }
  0x4d   : > { %5245 = shalt.err (!%p5242_p3)
}
  0x4e   : > { %4476 = dma.hbm_to_vmem [thread:$0]  (!%p5660_p6), %s6557_s6, 32, %s5656_s17, [#allocation9]  }
  0x4f   : > { %s6558_s8 = sld [smem:[#allocation31_spill]] }
  0x55   : > { %s5246_s24 = scalar_lea.hbm %s6558_s8, 32 }
  0x56   : > { %p5247_p11 = scmp.ne.s32.totalorder %s6558_s8, %s5246_s24  ;;  %p5253_p0 = scmp.lt.u32.totalorder %s5246_s24, %s6558_s8 }
  0x58   : > { %p5249_p12 = pnand %p5247_p11, %p5676_p8 }
  0x5a   : > { %p5250_p13 = pneg %p5249_p12 }
  0x5c   : > { %p5255_p2 = pnand %p5253_p0, %p5250_p13 }
  0x5e   : > { %5258 = shalt.err (!%p5255_p2)
}
  0x5f   : > { %s5259_s17 = scalar_lea.vmem %s5664_s19, 32  ;;  %p5267_p10 = scmp.lt.s32.totalorder %s5664_s19, %s5664_s19 }
  0x60   : > { %p5260_p5 = scmp.ne.s32.totalorder %s5664_s19, %s5259_s17  ;;  %p5268_p3 = scmp.lt.s32.totalorder %s5259_s17, %s5259_s17 }
  0x62   : > { %p5262_p7 = pnand %p5260_p5, %p5676_p8  ;;  %p5269_p11 = por %p5268_p3, %p5267_p10 }
  0x64   : > { %p5263_p9 = pneg %p5262_p7 }
  0x66   : > { %p5270_p12 = pnand %p5269_p11, %p5263_p9 }
  0x68   : > { %5273 = shalt.err (!%p5270_p12)
}
  0x69   : > { %4482 = dma.hbm_to_vmem [thread:$0]  (!%p5660_p6), %s6558_s8, 32, %s5664_s19, [#allocation12]  }
  0x6a   : > { %s5538_s1 = smov [#allocation10]   ;;  %s5274_s29 = scalar_lea.hbm %s6539_s10, 32 }
  0x6b   : > { %s389_s5 = sshll.u32 %s5538_s1, 4  ;;  %p5275_p13 = scmp.ne.s32.totalorder %s6539_s10, %s5274_s29  ;;  %s390_s5 = int_to_ptr.vmem [resolvable:$true] %s389_s5 }
  0x6c   : > { %p5281_p5 = scmp.lt.u32.totalorder %s5274_s29, %s6539_s10 }
  0x6d   : > { %p5277_p0 = pnand %p5275_p13, %p5676_p8 }
  0x6f   : > { %p5278_p2 = pneg %p5277_p0 }
  0x71   : > { %p5283_p7 = pnand %p5281_p5, %p5278_p2 }
  0x73   : > { %5286 = shalt.err (!%p5283_p7)
}
  0x74   : > { %s5287_s19 = scalar_lea.vmem %s428_s22, 32  ;;  %p5295_p11 = scmp.lt.s32.totalorder %s428_s22, %s428_s22 }
  0x75   : > { %p5288_p9 = scmp.ne.s32.totalorder %s428_s22, %s5287_s19  ;;  %p5296_p12 = scmp.lt.s32.totalorder %s5287_s19, %s5287_s19 }
  0x77   : > { %p5290_p10 = pnand %p5288_p9, %p5676_p8  ;;  %p5297_p1 = por %p5296_p12, %p5295_p11 }
  0x79   : > { %p5291_p3 = pneg %p5290_p10 }
  0x7b   : > { %p5298_p4 = pnand %p5297_p1, %p5291_p3 }
  0x7d   : > { %5301 = shalt.err (!%p5298_p4)
}
  0x7e   : > { %4488 = dma.hbm_to_vmem [thread:$0]  (!%p5660_p6), %s6539_s10, 32, %s428_s22, [#allocation15]  }
  0x7f   : > { %s5302_s24 = scalar_lea.hbm %s6536_s7, 4096 }
  0x80   : > { %p5303_p13 = scmp.ne.s32.totalorder %s6536_s7, %s5302_s24  ;;  %p5309_p4 = scmp.lt.u32.totalorder %s5302_s24, %s6536_s7 }
  0x82   : > { %p5305_p0 = pnand %p5303_p13, %p5676_p8 }
  0x84   : > { %p5306_p1 = pneg %p5305_p0 }
  0x86   : > { %p5311_p2 = pnand %p5309_p4, %p5306_p1 }
  0x88   : > { %5314 = shalt.err (!%p5311_p2)
}
  0x89   : > { %s5315_s17 = scalar_lea.vmem %s390_s5, 4096  ;;  %p5323_p10 = scmp.lt.s32.totalorder %s390_s5, %s390_s5 }
  0x8a   : > { %p5316_p5 = scmp.ne.s32.totalorder %s390_s5, %s5315_s17  ;;  %p5324_p3 = scmp.lt.s32.totalorder %s5315_s17, %s5315_s17 }
  0x8c   : > { %p5318_p7 = pnand %p5316_p5, %p5676_p8  ;;  %p5325_p11 = por %p5324_p3, %p5323_p10 }
  0x8e   : > { %p5319_p9 = pneg %p5318_p7 }
  0x90   : > { %p5326_p12 = pnand %p5325_p11, %p5319_p9 }
  0x92   : > { %5329 = shalt.err (!%p5326_p12)
}
  0x93   : > { %s5539_s22 = smov 128   ;;  %s5540_s19 = smov 8  }
  0x94   : > { %4479 = dma.hbm_to_vmem [thread:$0]  (!%p5660_p6), %s6536_s7, 4096, %s390_s5, [#allocation9], %s5539_s22, %s5539_s22, %s5540_s19  }
  0x95   : > { %s5541_s1 = smov [#allocation13]   ;;  %s5542_s24 = smov [#allocation16]  }
  0x96   : > { %s413_s23 = sshll.u32 %s5541_s1, 4  ;;  %s437_s29 = sshll.u32 %s5542_s24, 4  ;;  %s414_s23 = int_to_ptr.vmem [resolvable:$true] %s413_s23  ;;  %s438_s29 = int_to_ptr.vmem [resolvable:$true] %s437_s29 }
  0x97   : > { %s5330_s13 = scalar_lea.hbm %s6538_s9, 4096 }
  0x98   : > { %p5331_p13 = scmp.ne.s32.totalorder %s6538_s9, %s5330_s13  ;;  %p5337_p4 = scmp.lt.u32.totalorder %s5330_s13, %s6538_s9 }
  0x9a   : > { %p5333_p0 = pnand %p5331_p13, %p5676_p8 }
  0x9c   : > { %p5334_p1 = pneg %p5333_p0 }
  0x9e   : > { %p5339_p2 = pnand %p5337_p4, %p5334_p1 }
  0xa0   : > { %5342 = shalt.err (!%p5339_p2)
}
  0xa1   : > { %s5343_s5 = scalar_lea.vmem %s414_s23, 4096  ;;  %p5351_p10 = scmp.lt.s32.totalorder %s414_s23, %s414_s23 }
  0xa2   : > { %p5344_p5 = scmp.ne.s32.totalorder %s414_s23, %s5343_s5  ;;  %p5352_p3 = scmp.lt.s32.totalorder %s5343_s5, %s5343_s5 }
  0xa4   : > { %p5346_p7 = pnand %p5344_p5, %p5676_p8  ;;  %p5353_p11 = por %p5352_p3, %p5351_p10 }
  0xa6   : > { %p5347_p9 = pneg %p5346_p7 }
  0xa8   : > { %p5354_p12 = pnand %p5353_p11, %p5347_p9 }
  0xaa   : > { %5357 = shalt.err (!%p5354_p12)
}
  0xab   : > { %4485 = dma.hbm_to_vmem [thread:$0]  (!%p5660_p6), %s6538_s9, 4096, %s414_s23, [#allocation12], %s5539_s22, %s5539_s22, %s5540_s19  }
  0xac   : > { %s5358_s0 = scalar_lea.hbm %s6540_s11, 2048 }
  0xad   : > { %p5359_p13 = scmp.ne.s32.totalorder %s6540_s11, %s5358_s0  ;;  %p5365_p4 = scmp.lt.u32.totalorder %s5358_s0, %s6540_s11 }
  0xaf   : > { %p5361_p0 = pnand %p5359_p13, %p5676_p8 }
  0xb1   : > { %p5362_p1 = pneg %p5361_p0 }
  0xb3   : > { %p5367_p2 = pnand %p5365_p4, %p5362_p1 }
  0xb5   : > { %5370 = shalt.err (!%p5367_p2)
}
  0xb6   : > { %s5371_s13 = scalar_lea.vmem %s438_s29, 2048  ;;  %p5379_p10 = scmp.lt.s32.totalorder %s438_s29, %s438_s29 }
  0xb7   : > { %p5372_p5 = scmp.ne.s32.totalorder %s438_s29, %s5371_s13  ;;  %p5380_p3 = scmp.lt.s32.totalorder %s5371_s13, %s5371_s13 }
  0xb9   : > { %p5374_p7 = pnand %p5372_p5, %p5676_p8  ;;  %p5381_p11 = por %p5380_p3, %p5379_p10 }
  0xbb   : > { %p5375_p9 = pneg %p5374_p7 }
  0xbd   : > { %p5382_p12 = pnand %p5381_p11, %p5375_p9 }
  0xbf   : > { %5385 = shalt.err (!%p5382_p12)
}
  0xc0   : > { %s5543_s22 = smov 64   ;;  %s5544_s19 = smov 4  }
  0xc1   : > { %4491 = dma.hbm_to_vmem [thread:$0]  (!%p5660_p6), %s6540_s11, 2048, %s438_s29, [#allocation15], %s5543_s22, %s5543_s22, %s5544_s19  }
  0xc2   : > { %s5545_s5 = smov [#allocation17]   ;;  %s5386_s8 = scalar_lea.hbm %s6541_s12, 16 }
  0xc3   : > { %s451_s4 = sshll.u32 %s5545_s5, 4  ;;  %p5387_p13 = scmp.ne.s32.totalorder %s6541_s12, %s5386_s8  ;;  %s452_s4 = int_to_ptr.vmem [resolvable:$true] %s451_s4 }
  0xc4   : > { %p5393_p4 = scmp.lt.u32.totalorder %s5386_s8, %s6541_s12 }
  0xc5   : > { %p5389_p0 = pnand %p5387_p13, %p5676_p8 }
  0xc7   : > { %p5390_p1 = pneg %p5389_p0 }
  0xc9   : > { %p5395_p2 = pnand %p5393_p4, %p5390_p1 }
  0xcb   : > { %5398 = shalt.err (!%p5395_p2)
}
  0xcc   : > { %s5399_s29 = scalar_lea.vmem %s452_s4, 16  ;;  %s5406_s21 = scalar_lea.vmem %s452_s4, 32 }
  0xcd   : > { %p5400_p5 = scmp.ne.s32.totalorder %s452_s4, %s5399_s29  ;;  %p5407_p10 = scmp.lt.s32.totalorder %s452_s4, %s452_s4 }
  0xce   : > { %p5408_p3 = scmp.lt.s32.totalorder %s5406_s21, %s5399_s29 }
  0xcf   : > { %p5402_p7 = pnand %p5400_p5, %p5676_p8 }
  0xd0   : > { %p5409_p11 = por %p5408_p3, %p5407_p10 }
  0xd1   : > { %p5403_p9 = pneg %p5402_p7 }
  0xd3   : > { %p5410_p12 = pnand %p5409_p11, %p5403_p9 }
  0xd5   : > { %5413 = shalt.err (!%p5410_p12)
}
  0xd6   : > { %4494 = dma.hbm_to_vmem [thread:$0]  (!%p5660_p6), %s6541_s12, 16, %s452_s4, [#allocation18]  }
  0xd7   : > { %s5835_s18 = sadd.s32 1, %s5532_s28   ;;  %s92_s20 = sadd.s32 1, %s5528_s27 }
  0xd8   : > { %s89_s19 = ssub.s32 %s5532_s28, %s5835_s18  ;;  %p99_p8 = scmp.ne.s32.totalorder %s5528_s27, %s5524_s26 }
  0xd9   : > { %p90_p13 = scmp.eq.s32.totalorder %s89_s19, 0  ;;  %p100_p0 = scmp.eq.s32.totalorder %s5532_s28, 0 }
  0xda   : > { %p105_p1 = scmp.ne.s32.totalorder %s5524_s26, %s5520_s25  ;;  %p4510_p4 = scmp.lt.s32.totalorder %s5532_s28, 2 }
  0xdb   : > { %s5847_s23 = scalar_select %p90_p13, %s5528_s27, %s92_s20  }
  0xdc   : > { %p101_p2 = por %p100_p0, %p99_p8  ;;  %p6559_p5 = scmp.eq.s32.totalorder %s5642_s14, 0 }
  0xdd   : > { %s480_s5 = sand.u32 1, %s5528_s27   ;;  %s4403_s4 = sshll.u32 %s5532_s28, 14 }
  0xde   : > { %p5851_p7 = por %p6559_p5, %p105_p1  ;;  %s5857_s30 = sshll.u32 %s480_s5, 10 }
  0xdf   : > { %s5864_s0 = scalar_lea.hbm %s6531_s2, %s4403_s4  ;;  %s484_s25 = scalar_lea.vmem [#allocation3], %s5857_s30 }
  0xe0   : > { %s492_s1 = sshll.u32 %s484_s25, 4  ;;  %p5867_p6 = pnand %p4510_p4, %p101_p2  ;;  %s5871_s1 = int_to_ptr.vmem [resolvable:$true] %s492_s1 }
  0xe1   : > { %s5873_s16 = scalar_lea.sflag [#allocation4], %s480_s5  ;;  %s5414_s29 = scalar_lea.hbm %s5864_s0, 16384 }
  0xe2   : > { %p5415_p9 = scmp.ne.s32.totalorder %s5864_s0, %s5414_s29  ;;  %p5416_p10 = pneg %p5867_p6 }
  0xe3   : > { %s5419_s22 = scalar_lea.hbm %s6531_s2, 32768  ;;  %p5420_p12 = scmp.lt.u32.totalorder %s5864_s0, %s6531_s2 }
  0xe4   : > { %p5417_p3 = pnand %p5416_p10, %p5415_p9  ;;  %p5421_p8 = scmp.lt.u32.totalorder %s5419_s22, %s5414_s29 }
  0xe5   : > { %p5423_p0 = scmp.lt.u32.totalorder %s5414_s29, %s5864_s0 }
  0xe6   : > { %p5418_p11 = pneg %p5417_p3  ;;  %p5422_p13 = por %p5421_p8, %p5420_p12 }
  0xe8   : > { %p5424_p1 = por %p5423_p0, %p5422_p13 }
  0xea   : > { %p5425_p4 = pnand %p5424_p1, %p5418_p11 }
  0xec   : > { %5428 = shalt.err (!%p5425_p4)
}
  0xed   : > { %s5429_s5 = scalar_lea.vmem %s5871_s1, 16384  ;;  %s5546_s6 = smov [#allocation3]  }
  0xee   : > { %p5430_p2 = scmp.ne.s32.totalorder %s5871_s1, %s5429_s5  ;;  %s5434_s8 = sshll.u32 %s5546_s6, 4  ;;  %s5435_s8 = int_to_ptr.vmem [resolvable:$false] %s5434_s8 }
  0xef   : > { %s5436_s25 = scalar_lea.vmem %s5435_s8, 32768  ;;  %p5437_p3 = scmp.lt.s32.totalorder %s5871_s1, %s5435_s8 }
  0xf0   : > { %p5432_p5 = pnand %p5430_p2, %p5416_p10  ;;  %p5438_p12 = scmp.lt.s32.totalorder %s5436_s25, %s5429_s5 }
  0xf2   : > { %p5433_p9 = pneg %p5432_p5  ;;  %p5439_p8 = por %p5438_p12, %p5437_p3 }
  0xf4   : > { %p5440_p13 = pnand %p5439_p8, %p5433_p9 }
  0xf6   : > { %5443 = shalt.err (!%p5440_p13)
}
  0xf7   : > { %s5547_s29 = smov 256   ;;  %s5548_s21 = smov 16  }
  0xf8   : > { %4498 = dma.hbm_to_vmem [thread:$0]  (!%p5867_p6), %s5864_s0, 16384, %s5871_s1, %s5873_s16, %s5547_s29, %s5547_s29, %s5548_s21  }
  0xf9   : > { %s5909_s20 = scalar_lea.hbm %s6532_s3, %s4403_s4  ;;  %s506_s19 = scalar_lea.vmem [#allocation5], %s5857_s30 }
  0xfa   : > { %s514_s5 = sshll.u32 %s506_s19, 4  ;;  %s502_s6 = sand.u32 1, %s5532_s28   ;;  %s5913_s5 = int_to_ptr.vmem [resolvable:$true] %s514_s5 }
  0xfb   : > { %s5915_s8 = scalar_lea.sflag [#allocation6], %s502_s6  ;;  %s5444_s25 = scalar_lea.hbm %s5909_s20, 16384 }
  0xfc   : > { %p5445_p11 = scmp.ne.s32.totalorder %s5909_s20, %s5444_s25  ;;  %s5449_s1 = scalar_lea.hbm %s6532_s3, 32768 }
  0xfd   : > { %p5450_p4 = scmp.lt.u32.totalorder %s5909_s20, %s6532_s3  ;;  %p5451_p2 = scmp.lt.u32.totalorder %s5449_s1, %s5444_s25 }
  0xfe   : > { %p5447_p0 = pnand %p5445_p11, %p5416_p10  ;;  %p5453_p9 = scmp.lt.u32.totalorder %s5444_s25, %s5909_s20 }
  0xff   : > { %p5452_p5 = por %p5451_p2, %p5450_p4 }
 0x100   : > { %p5448_p1 = pneg %p5447_p0 }
 0x101   : > { %p5454_p3 = por %p5453_p9, %p5452_p5 }
 0x103   : > { %p5455_p12 = pnand %p5454_p3, %p5448_p1 }
 0x105   : > { %5458 = shalt.err (!%p5455_p12)
}
 0x106   : > { %s5459_s28 = scalar_lea.vmem %s5913_s5, 16384  ;;  %s5549_s30 = smov [#allocation5]  }
 0x107   : > { %p5460_p8 = scmp.ne.s32.totalorder %s5913_s5, %s5459_s28  ;;  %s5464_s22 = sshll.u32 %s5549_s30, 4  ;;  %s5465_s22 = int_to_ptr.vmem [resolvable:$false] %s5464_s22 }
 0x108   : > { %s5466_s19 = scalar_lea.vmem %s5465_s22, 32768  ;;  %p5467_p0 = scmp.lt.s32.totalorder %s5913_s5, %s5465_s22 }
 0x109   : > { %p5462_p13 = pnand %p5460_p8, %p5416_p10  ;;  %p5468_p4 = scmp.lt.s32.totalorder %s5466_s19, %s5459_s28 }
 0x10b   : > { %p5463_p11 = pneg %p5462_p13  ;;  %p5469_p2 = por %p5468_p4, %p5467_p0 }
 0x10d   : > { %p5470_p5 = pnand %p5469_p2, %p5463_p11 }
 0x10f   : > { %5473 = shalt.err (!%p5470_p5)
}
 0x110   : > { %4501 = dma.hbm_to_vmem [thread:$0]  (!%p5867_p6), %s5909_s20, 16384, %s5913_s5, %s5915_s8, %s5547_s29, %s5547_s29, %s5548_s21  }
 0x111   : > { %p6562_p10 = scmp.ne.s32.totalorder %s6553_s15, 0 }
 0x112   : > { %s528_s6 = sand.u32 (!%p6562_p10), 1, %s5524_s26  }
 0x113   : > { %526 = sbr.rel (%p6562_p10) target bundleno = 1835 (0x72b), region = 72  ;;  %s3969_s25 = sshll.u32 (!%p6562_p10), %s528_s6, 10 }
 0x114   : > { %s529_s0 = scalar_lea.sflag (!%p6562_p10), [#allocation4], %s528_s6  ;;  %s5947_s4 = scalar_lea.vmem (!%p6562_p10), [#allocation3], %s3969_s25 }
 0x11a   : > { %5491 = dma.done.wait (%p5851_p7), %s529_s0, 16384  }
 0x11b   : > { %5493 = vsyncadd (%p5851_p7), %s529_s0, 4294950912  ;;  %s537_s24 = sand.u32 1, %s5642_s14   ;;  %s5954_s29 = scalar_lea.vmem [#allocation5], %s3969_s25 }
 0x11c   : > { %s538_s1 = scalar_lea.sflag [#allocation6], %s537_s24 }
 0x11d   : > { %5495 = dma.done.wait (%p5851_p7), %s538_s1, 16384  }
 0x11e   : > { %5497 = vsyncadd (%p5851_p7), %s538_s1, 4294950912  ;;  %p6563_p6 = scmp.eq.s32.totalorder %s5642_s14, 0 }
 0x120   : > { %5499 = dma.done.wait (%p6563_p6), [#allocation6], 64   ;;  %p6564_p1 = pmov %p6563_p6 }
 0x122   : > { %5501 = vsyncadd (%p6564_p1), [#allocation6], 4294967232  ;;  %p6565_p9 = pmov %p6564_p1 }
 0x123   : > { %p6566_p3 = pmov %p6564_p1 }
 0x124   : > { %5503 = dma.done.wait (%p6565_p9), [#allocation9], 4128  }
 0x125   : > { %5505 = vsyncadd (%p6566_p3), [#allocation9], 4294963168  ;;  %p6567_p12 = pmov %p6564_p1 }
 0x126   : > { %p6568_p8 = pmov %p6564_p1 }
 0x127   : > { %5507 = dma.done.wait (%p6567_p12), [#allocation12], 4128  }
 0x128   : > { %5509 = vsyncadd (%p6568_p8), [#allocation12], 4294963168  ;;  %p6569_p7 = pmov %p6564_p1 }
 0x129   : > { %p6570_p13 = pmov %p6564_p1 }
 0x12a   : > { %5511 = dma.done.wait (%p6569_p7), [#allocation15], 2080  }
 0x12b   : > { %5513 = vsyncadd (%p6570_p13), [#allocation15], 4294965216  ;;  %p6571_p11 = pmov %p6564_p1 }
 0x12c   : > { %p6572_p0 = pmov %p6564_p1 }
 0x12d   : > { %5515 = dma.done.wait (%p6571_p11), [#allocation18], 16  }
 0x12e   : > { %5517 = vsyncadd (%p6572_p0), [#allocation18], 4294967280  ;;  %s3979_s15 = sshll.u32 %s5642_s14, 2  ;;  %s6573_s5 = sld [smem:[#allocation26_spill]] }
 0x12f   : > { %p627_p4 = scmp.lt.s32.totalorder %s3979_s15, 7  ;;  %s6574_s28 = sld [smem:[#allocation27_spill]] }
 0x130   : > { %p6575_p2 = scmp.ne.s32.totalorder %s5642_s14, 0 }
 0x131   : > { %s6583_s15 = smov (!%p627_p4, %s3979_s15), 7  ;;  %v5550_v0 = vmov (!%p6575_p2), 0.0  }
 0x132   : > { %s3980_s17 = sshll.u32 %s6583_s15, 2  ;;  %644 = sbr.rel (%p6575_p2) target bundleno = 313 (0x139), region = 116  ;;  %645 = vst [vmem:[#allocation2] sm:$0xff] (!%p6575_p2), %v5550_v0  ;;  %646 = vst [vmem:[#allocation2 + $0x8] sm:$0xff] (!%p6575_p2), %v5550_v0 }
 0x133   : > { %647 = vst [vmem:[#allocation2 + $0x10] sm:$0xff] (!%p6575_p2), %v5550_v0  ;;  %648 = vst [vmem:[#allocation2 + $0x18] sm:$0xff] (!%p6575_p2), %v5550_v0 }
 0x134   : > { %s5984_s8 = scalar_lea.vmem %s6573_s5, %s3980_s17 }
 0x135   : > { %s5989_s30 = scalar_lea.vmem %s6574_s28, %s3980_s17 }
 0x139 PF: > { %v4566_v1 = vld [vmem:[%s5954_s29 + $0x4] ss:$16 sps:$4 sm:$0xff]   ;;  %v4570_v3 = vld [vmem:[%s5954_s29] ss:$16 sps:$4 sm:$0xff]   ;;  %v784_v49 = vld [vmem:[%s5989_s30 + $0x8] sm:$0xff]  ;;  %p4248_p5 = scmp.ne.s32.totalorder %s5642_s14, 1 }
 0x13a   : > { %v4568_v2 = vld [vmem:[%s5954_s29 + $0x204] ss:$16 sps:$4 sm:$0xff]   ;;  %1567 = vmatprep.subr.bf16.mxu0 %v4566_v1  ;;  %v4571_v4 = vld [vmem:[%s5954_s29 + $0x200] ss:$16 sps:$4 sm:$0xff]   ;;  %v3987_v52 = vcombine.high %v784_v49, %v784_v49  ;;  %s6576_s6 = sld [smem:[#allocation29_spill]] (!%p4248_p5)  ;;  %s6577_s13 = sld [smem:[#allocation32_spill]] (!%p4248_p5) }
 0x13b   : > { %1608 = vmatprep.subr.bf16.mxu1 %v4568_v2  ;;  %v4572_v5 = vld [vmem:[%s5954_s29 + $0x24] ss:$16 sps:$4 sm:$0xff]   ;;  %1568 = vmatpush1.bf16.msra.mxu0 %v4570_v3  ;;  %v4576_v7 = vld [vmem:[%s5954_s29 + $0x20] ss:$16 sps:$4 sm:$0xff]  }
 0x13c   : > { %1609 = vmatpush1.bf16.msra.mxu1 %v4571_v4  ;;  %v4574_v6 = vld [vmem:[%s5954_s29 + $0x224] ss:$16 sps:$4 sm:$0xff]   ;;  %1569 = vmatprep.subr.bf16.mxu0 %v4572_v5  ;;  %v4577_v8 = vld [vmem:[%s5954_s29 + $0x220] ss:$16 sps:$4 sm:$0xff]   ;;  %v4668_v5 = vld [vmem:[%s5954_s29 + $0xc] ss:$16 sps:$4 sm:$0xff]  }
 0x13d   : > { %1610 = vmatprep.subr.bf16.mxu1 %v4574_v6  ;;  %v4578_v9 = vld [vmem:[%s5954_s29 + $0x44] ss:$16 sps:$4 sm:$0xff]   ;;  %v4582_v11 = vld [vmem:[%s5954_s29 + $0x40] ss:$16 sps:$4 sm:$0xff]   ;;  %1640 = vmatprep.mubr.bf16.mxu1 %v3987_v52  ;;  %v4671_v6 = vld [vmem:[%s5954_s29 + $0x20c] ss:$16 sps:$4 sm:$0xff]  }
 0x13e   : > { %v4580_v10 = vld [vmem:[%s5954_s29 + $0x244] ss:$16 sps:$4 sm:$0xff]   ;;  %v4583_v12 = vld [vmem:[%s5954_s29 + $0x240] ss:$16 sps:$4 sm:$0xff]  }
 0x13f   : > { %1570 = vmatpush1.bf16.msra.mxu0 %v4576_v7  ;;  %v4584_v13 = vld [vmem:[%s5954_s29 + $0x64] ss:$16 sps:$4 sm:$0xff]   ;;  %v4588_v15 = vld [vmem:[%s5954_s29 + $0x60] ss:$16 sps:$4 sm:$0xff]  }
 0x140   : > { %1611 = vmatpush1.bf16.msra.mxu1 %v4577_v8  ;;  %1571 = vmatprep.subr.bf16.mxu0 %v4578_v9  ;;  %v4586_v14 = vld [vmem:[%s5954_s29 + $0x264] ss:$16 sps:$4 sm:$0xff]   ;;  %v4589_v16 = vld [vmem:[%s5954_s29 + $0x260] ss:$16 sps:$4 sm:$0xff]   ;;  %v6066_v8 = vcombine.low %v784_v49, %v784_v49  ;;  %v4666_v9 = vld [vmem:[%s5954_s29 + $0x8] ss:$16 sps:$4 sm:$0xff]  }
 0x141   : > { %1612 = vmatprep.subr.bf16.mxu1 %v4580_v10  ;;  %v4590_v17 = vld [vmem:[%s5954_s29 + $0x84] ss:$16 sps:$4 sm:$0xff]   ;;  %v4594_v19 = vld [vmem:[%s5954_s29 + $0x80] ss:$16 sps:$4 sm:$0xff]   ;;  %v4669_v10 = vld [vmem:[%s5954_s29 + $0x208] ss:$16 sps:$4 sm:$0xff]  }
 0x142   : > { %v4592_v18 = vld [vmem:[%s5954_s29 + $0x284] ss:$16 sps:$4 sm:$0xff]   ;;  %v4595_v20 = vld [vmem:[%s5954_s29 + $0x280] ss:$16 sps:$4 sm:$0xff]   ;;  %v4726_v49 = vld [vmem:[%s5954_s29 + $0x148] ss:$16 sps:$4 sm:$0xff]  }
 0x143   : > { %1572 = vmatpush1.bf16.msra.mxu0 %v4582_v11  ;;  %v4596_v21 = vld [vmem:[%s5954_s29 + $0xa4] ss:$16 sps:$4 sm:$0xff]   ;;  %v4600_v23 = vld [vmem:[%s5954_s29 + $0xa0] ss:$16 sps:$4 sm:$0xff]   ;;  %v4674_v11 = vld [vmem:[%s5954_s29 + $0x2c] ss:$16 sps:$4 sm:$0xff]  }
 0x144   : > { %1613 = vmatpush1.bf16.msra.mxu1 %v4583_v12  ;;  %1573 = vmatprep.subr.bf16.mxu0 %v4584_v13  ;;  %v4598_v22 = vld [vmem:[%s5954_s29 + $0x2a4] ss:$16 sps:$4 sm:$0xff]   ;;  %v4601_v24 = vld [vmem:[%s5954_s29 + $0x2a0] ss:$16 sps:$4 sm:$0xff]   ;;  %v4677_v12 = vld [vmem:[%s5954_s29 + $0x22c] ss:$16 sps:$4 sm:$0xff]  }
 0x145   : > { %1614 = vmatprep.subr.bf16.mxu1 %v4586_v14  ;;  %v4602_v25 = vld [vmem:[%s5954_s29 + $0xc4] ss:$16 sps:$4 sm:$0xff]   ;;  %v4606_v27 = vld [vmem:[%s5954_s29 + $0xc0] ss:$16 sps:$4 sm:$0xff]   ;;  %v4672_v13 = vld [vmem:[%s5954_s29 + $0x28] ss:$16 sps:$4 sm:$0xff]  }
 0x146   : > { %v4604_v26 = vld [vmem:[%s5954_s29 + $0x2c4] ss:$16 sps:$4 sm:$0xff]   ;;  %v4607_v28 = vld [vmem:[%s5954_s29 + $0x2c0] ss:$16 sps:$4 sm:$0xff]   ;;  %v4675_v14 = vld [vmem:[%s5954_s29 + $0x228] ss:$16 sps:$4 sm:$0xff]  }
 0x147   : > { %1574 = vmatpush1.bf16.msra.mxu0 %v4588_v15  ;;  %v4608_v29 = vld [vmem:[%s5954_s29 + $0xe4] ss:$16 sps:$4 sm:$0xff]   ;;  %v4612_v31 = vld [vmem:[%s5954_s29 + $0xe0] ss:$16 sps:$4 sm:$0xff]   ;;  %v4680_v15 = vld [vmem:[%s5954_s29 + $0x4c] ss:$16 sps:$4 sm:$0xff]  }
 0x148   : > { %1615 = vmatpush1.bf16.msra.mxu1 %v4589_v16  ;;  %1575 = vmatprep.subr.bf16.mxu0 %v4590_v17  ;;  %v4610_v30 = vld [vmem:[%s5954_s29 + $0x2e4] ss:$16 sps:$4 sm:$0xff]   ;;  %v4613_v32 = vld [vmem:[%s5954_s29 + $0x2e0] ss:$16 sps:$4 sm:$0xff]   ;;  %v4683_v16 = vld [vmem:[%s5954_s29 + $0x24c] ss:$16 sps:$4 sm:$0xff]  }
 0x149   : > { %1616 = vmatprep.subr.bf16.mxu1 %v4592_v18  ;;  %v4614_v33 = vld [vmem:[%s5954_s29 + $0x104] ss:$16 sps:$4 sm:$0xff]   ;;  %v4618_v35 = vld [vmem:[%s5954_s29 + $0x100] ss:$16 sps:$4 sm:$0xff]   ;;  %v4678_v17 = vld [vmem:[%s5954_s29 + $0x48] ss:$16 sps:$4 sm:$0xff]  }
 0x14a   : > { %v4616_v34 = vld [vmem:[%s5954_s29 + $0x304] ss:$16 sps:$4 sm:$0xff]   ;;  %v4619_v36 = vld [vmem:[%s5954_s29 + $0x300] ss:$16 sps:$4 sm:$0xff]   ;;  %v4681_v18 = vld [vmem:[%s5954_s29 + $0x248] ss:$16 sps:$4 sm:$0xff]  }
 0x14b   : > { %1576 = vmatpush1.bf16.msra.mxu0 %v4594_v19  ;;  %v4620_v37 = vld [vmem:[%s5954_s29 + $0x124] ss:$16 sps:$4 sm:$0xff]   ;;  %v4624_v39 = vld [vmem:[%s5954_s29 + $0x120] ss:$16 sps:$4 sm:$0xff]   ;;  %v4686_v19 = vld [vmem:[%s5954_s29 + $0x6c] ss:$16 sps:$4 sm:$0xff]  }
 0x14c   : > { %1617 = vmatpush1.bf16.msra.mxu1 %v4595_v20  ;;  %1577 = vmatprep.subr.bf16.mxu0 %v4596_v21  ;;  %v4622_v38 = vld [vmem:[%s5954_s29 + $0x324] ss:$16 sps:$4 sm:$0xff]   ;;  %v4625_v40 = vld [vmem:[%s5954_s29 + $0x320] ss:$16 sps:$4 sm:$0xff]   ;;  %v4689_v20 = vld [vmem:[%s5954_s29 + $0x26c] ss:$16 sps:$4 sm:$0xff]  }
 0x14d   : > { %1618 = vmatprep.subr.bf16.mxu1 %v4598_v22  ;;  %v4626_v41 = vld [vmem:[%s5954_s29 + $0x144] ss:$16 sps:$4 sm:$0xff]   ;;  %v4630_v43 = vld [vmem:[%s5954_s29 + $0x140] ss:$16 sps:$4 sm:$0xff]   ;;  %v4684_v21 = vld [vmem:[%s5954_s29 + $0x68] ss:$16 sps:$4 sm:$0xff]  }
 0x14e   : > { %v4628_v42 = vld [vmem:[%s5954_s29 + $0x344] ss:$16 sps:$4 sm:$0xff]   ;;  %v4631_v44 = vld [vmem:[%s5954_s29 + $0x340] ss:$16 sps:$4 sm:$0xff]   ;;  %v4687_v22 = vld [vmem:[%s5954_s29 + $0x268] ss:$16 sps:$4 sm:$0xff]  }
 0x14f   : > { %1578 = vmatpush1.bf16.msra.mxu0 %v4600_v23  ;;  %v4632_v45 = vld [vmem:[%s5954_s29 + $0x164] ss:$16 sps:$4 sm:$0xff]   ;;  %v4636_v50 = vld [vmem:[%s5954_s29 + $0x160] ss:$16 sps:$4 sm:$0xff]   ;;  %v4692_v23 = vld [vmem:[%s5954_s29 + $0x8c] ss:$16 sps:$4 sm:$0xff]  }
 0x150   : > { %1619 = vmatpush1.bf16.msra.mxu1 %v4601_v24  ;;  %1579 = vmatprep.subr.bf16.mxu0 %v4602_v25  ;;  %v4634_v46 = vld [vmem:[%s5954_s29 + $0x364] ss:$16 sps:$4 sm:$0xff]   ;;  %v4637_v51 = vld [vmem:[%s5954_s29 + $0x360] ss:$16 sps:$4 sm:$0xff]   ;;  %v4695_v24 = vld [vmem:[%s5954_s29 + $0x28c] ss:$16 sps:$4 sm:$0xff]  }
 0x151   : > { %1620 = vmatprep.subr.bf16.mxu1 %v4604_v26  ;;  %v783_v47 = vld [vmem:[%s5989_s30] sm:$0xff]  ;;  %v4690_v25 = vld [vmem:[%s5954_s29 + $0x88] ss:$16 sps:$4 sm:$0xff]  }
 0x152   : > { %v6040_v48 = vcombine.high %v783_v47, %v783_v47  ;;  %v4638_v53 = vld [vmem:[%s5954_s29 + $0x184] ss:$16 sps:$4 sm:$0xff]   ;;  %v4642_v55 = vld [vmem:[%s5954_s29 + $0x180] ss:$16 sps:$4 sm:$0xff]   ;;  %v6064_v7 = vcombine.low %v783_v47, %v783_v47  ;;  %v4693_v26 = vld [vmem:[%s5954_s29 + $0x288] ss:$16 sps:$4 sm:$0xff]  }
 0x153   : > { %1580 = vmatpush1.bf16.msra.mxu0 %v4606_v27  ;;  %v4640_v54 = vld [vmem:[%s5954_s29 + $0x384] ss:$16 sps:$4 sm:$0xff]   ;;  %v4643_v56 = vld [vmem:[%s5954_s29 + $0x380] ss:$16 sps:$4 sm:$0xff]   ;;  %v4698_v27 = vld [vmem:[%s5954_s29 + $0xac] ss:$16 sps:$4 sm:$0xff]  }
 0x154   : > { %1621 = vmatpush1.bf16.msra.mxu1 %v4607_v28  ;;  %1581 = vmatprep.subr.bf16.mxu0 %v4608_v29  ;;  %v4644_v57 = vld [vmem:[%s5954_s29 + $0x1a4] ss:$16 sps:$4 sm:$0xff]   ;;  %v4648_v59 = vld [vmem:[%s5954_s29 + $0x1a0] ss:$16 sps:$4 sm:$0xff]   ;;  %v4701_v28 = vld [vmem:[%s5954_s29 + $0x2ac] ss:$16 sps:$4 sm:$0xff]  }
 0x155   : > { %1622 = vmatprep.subr.bf16.mxu1 %v4610_v30  ;;  %1599 = vmatprep.mubr.bf16.mxu0 %v6040_v48  ;;  %v4646_v58 = vld [vmem:[%s5954_s29 + $0x3a4] ss:$16 sps:$4 sm:$0xff]   ;;  %v4649_v60 = vld [vmem:[%s5954_s29 + $0x3a0] ss:$16 sps:$4 sm:$0xff]   ;;  %v4696_v29 = vld [vmem:[%s5954_s29 + $0xa8] ss:$16 sps:$4 sm:$0xff]  }
 0x156   : > { %v4650_v61 = vld [vmem:[%s5954_s29 + $0x1c4] ss:$16 sps:$4 sm:$0xff]   ;;  %v4654_v63 = vld [vmem:[%s5954_s29 + $0x1c0] ss:$16 sps:$4 sm:$0xff]   ;;  %v4699_v30 = vld [vmem:[%s5954_s29 + $0x2a8] ss:$16 sps:$4 sm:$0xff]  }
 0x157   : > { %1582 = vmatpush1.bf16.msra.mxu0 %v4612_v31  ;;  %v4652_v62 = vld [vmem:[%s5954_s29 + $0x3c4] ss:$16 sps:$4 sm:$0xff]   ;;  %v4655_v0 = vld [vmem:[%s5954_s29 + $0x3c0] ss:$16 sps:$4 sm:$0xff]   ;;  %v4704_v31 = vld [vmem:[%s5954_s29 + $0xcc] ss:$16 sps:$4 sm:$0xff]  }
 0x158   : > { %1623 = vmatpush1.bf16.msra.mxu1 %v4613_v32  ;;  %1583 = vmatprep.subr.bf16.mxu0 %v4614_v33  ;;  %v4656_v1 = vld [vmem:[%s5954_s29 + $0x1e4] ss:$16 sps:$4 sm:$0xff]   ;;  %v4660_v3 = vld [vmem:[%s5954_s29 + $0x1e0] ss:$16 sps:$4 sm:$0xff]   ;;  %v4707_v32 = vld [vmem:[%s5954_s29 + $0x2cc] ss:$16 sps:$4 sm:$0xff]  }
 0x159   : > { %1624 = vmatprep.subr.bf16.mxu1 %v4616_v34  ;;  %v4658_v2 = vld [vmem:[%s5954_s29 + $0x3e4] ss:$16 sps:$4 sm:$0xff]   ;;  %v4661_v4 = vld [vmem:[%s5954_s29 + $0x3e0] ss:$16 sps:$4 sm:$0xff]   ;;  %v4702_v33 = vld [vmem:[%s5954_s29 + $0xc8] ss:$16 sps:$4 sm:$0xff]  }
 0x15a   : > { %v4705_v34 = vld [vmem:[%s5954_s29 + $0x2c8] ss:$16 sps:$4 sm:$0xff]   ;;  %v4728_v47 = vld [vmem:[%s5954_s29 + $0x14c] ss:$16 sps:$4 sm:$0xff]  }
 0x15b   : > { %1584 = vmatpush1.bf16.msra.mxu0 %v4618_v35  ;;  %v4710_v35 = vld [vmem:[%s5954_s29 + $0xec] ss:$16 sps:$4 sm:$0xff]  }
 0x15c   : > { %1625 = vmatpush1.bf16.msra.mxu1 %v4619_v36  ;;  %1585 = vmatprep.subr.bf16.mxu0 %v4620_v37  ;;  %v4713_v36 = vld [vmem:[%s5954_s29 + $0x2ec] ss:$16 sps:$4 sm:$0xff]   ;;  %v4708_v37 = vld [vmem:[%s5954_s29 + $0xe8] ss:$16 sps:$4 sm:$0xff]  }
 0x15d   : > { %1626 = vmatprep.subr.bf16.mxu1 %v4622_v38  ;;  %v4711_v38 = vld [vmem:[%s5954_s29 + $0x2e8] ss:$16 sps:$4 sm:$0xff]  }
 0x15f   : > { %1586 = vmatpush1.bf16.msra.mxu0 %v4624_v39  ;;  %v4716_v39 = vld [vmem:[%s5954_s29 + $0x10c] ss:$16 sps:$4 sm:$0xff]  }
 0x160   : > { %1627 = vmatpush1.bf16.msra.mxu1 %v4625_v40  ;;  %1587 = vmatprep.subr.bf16.mxu0 %v4626_v41  ;;  %v4719_v40 = vld [vmem:[%s5954_s29 + $0x30c] ss:$16 sps:$4 sm:$0xff]   ;;  %v4714_v41 = vld [vmem:[%s5954_s29 + $0x108] ss:$16 sps:$4 sm:$0xff]  }
 0x161   : > { %1628 = vmatprep.subr.bf16.mxu1 %v4628_v42  ;;  %v4717_v42 = vld [vmem:[%s5954_s29 + $0x308] ss:$16 sps:$4 sm:$0xff]  }
 0x163   : > { %1588 = vmatpush1.bf16.msra.mxu0 %v4630_v43  ;;  %v4722_v43 = vld [vmem:[%s5954_s29 + $0x12c] ss:$16 sps:$4 sm:$0xff]  }
 0x164   : > { %1629 = vmatpush1.bf16.msra.mxu1 %v4631_v44  ;;  %1589 = vmatprep.subr.bf16.mxu0 %v4632_v45  ;;  %v4725_v44 = vld [vmem:[%s5954_s29 + $0x32c] ss:$16 sps:$4 sm:$0xff]   ;;  %v4720_v45 = vld [vmem:[%s5954_s29 + $0x128] ss:$16 sps:$4 sm:$0xff]  }
 0x165   : > { %1630 = vmatprep.subr.bf16.mxu1 %v4634_v46  ;;  %v4723_v46 = vld [vmem:[%s5954_s29 + $0x328] ss:$16 sps:$4 sm:$0xff]  }
 0x167   : > { %1590 = vmatpush1.bf16.msra.mxu0 %v4636_v50  ;;  %v4729_v50 = vld [vmem:[%s5954_s29 + $0x348] ss:$16 sps:$4 sm:$0xff]  }
 0x168   : > { %1631 = vmatpush1.bf16.msra.mxu1 %v4637_v51  ;;  %1591 = vmatprep.subr.bf16.mxu0 %v4638_v53  ;;  %v4734_v51 = vld [vmem:[%s5954_s29 + $0x16c] ss:$16 sps:$4 sm:$0xff]   ;;  %v4732_v53 = vld [vmem:[%s5954_s29 + $0x168] ss:$16 sps:$4 sm:$0xff]  }
 0x169   : > { %1632 = vmatprep.subr.bf16.mxu1 %v4640_v54  ;;  %v4735_v54 = vld [vmem:[%s5954_s29 + $0x368] ss:$16 sps:$4 sm:$0xff]  }
 0x16b   : > { %1592 = vmatpush1.bf16.msra.mxu0 %v4642_v55  ;;  %v4740_v55 = vld [vmem:[%s5954_s29 + $0x18c] ss:$16 sps:$4 sm:$0xff]  }
 0x16c   : > { %1633 = vmatpush1.bf16.msra.mxu1 %v4643_v56  ;;  %1593 = vmatprep.subr.bf16.mxu0 %v4644_v57  ;;  %v4743_v56 = vld [vmem:[%s5954_s29 + $0x38c] ss:$16 sps:$4 sm:$0xff]   ;;  %v4738_v57 = vld [vmem:[%s5954_s29 + $0x188] ss:$16 sps:$4 sm:$0xff]  }
 0x16d   : > { %1634 = vmatprep.subr.bf16.mxu1 %v4646_v58  ;;  %v4741_v58 = vld [vmem:[%s5954_s29 + $0x388] ss:$16 sps:$4 sm:$0xff]  }
 0x16f   : > { %1594 = vmatpush1.bf16.msra.mxu0 %v4648_v59  ;;  %v4746_v59 = vld [vmem:[%s5954_s29 + $0x1ac] ss:$16 sps:$4 sm:$0xff]  }
 0x170   : > { %1635 = vmatpush1.bf16.msra.mxu1 %v4649_v60  ;;  %1595 = vmatprep.subr.bf16.mxu0 %v4650_v61  ;;  %v4749_v60 = vld [vmem:[%s5954_s29 + $0x3ac] ss:$16 sps:$4 sm:$0xff]   ;;  %v4744_v61 = vld [vmem:[%s5954_s29 + $0x1a8] ss:$16 sps:$4 sm:$0xff]  }
 0x171   : > { %1636 = vmatprep.subr.bf16.mxu1 %v4652_v62  ;;  %v4747_v62 = vld [vmem:[%s5954_s29 + $0x3a8] ss:$16 sps:$4 sm:$0xff]  }
 0x173   : > { %1596 = vmatpush1.bf16.msra.mxu0 %v4654_v63  ;;  %v4752_v63 = vld [vmem:[%s5954_s29 + $0x1cc] ss:$16 sps:$4 sm:$0xff]  }
 0x174   : > { %1637 = vmatpush1.bf16.msra.mxu1 %v4655_v0  ;;  %1597 = vmatprep.subr.bf16.mxu0 %v4656_v1  ;;  %v4755_v0 = vld [vmem:[%s5954_s29 + $0x3cc] ss:$16 sps:$4 sm:$0xff]   ;;  %v4750_v1 = vld [vmem:[%s5954_s29 + $0x1c8] ss:$16 sps:$4 sm:$0xff]  }
 0x175   : > { %1638 = vmatprep.subr.bf16.mxu1 %v4658_v2  ;;  %v4753_v2 = vld [vmem:[%s5954_s29 + $0x3c8] ss:$16 sps:$4 sm:$0xff]  }
 0x177   : > { %1598 = vmatpush1.bf16.msra.mxu0 %v4660_v3  ;;  %v4758_v3 = vld [vmem:[%s5954_s29 + $0x1ec] ss:$16 sps:$4 sm:$0xff]  }
 0x178   : > { %1639 = vmatpush1.bf16.msra.mxu1 %v4661_v4  ;;  %1649 = vmatprep.subr.bf16.mxu0 %v4668_v5  ;;  %v4761_v4 = vld [vmem:[%s5954_s29 + $0x3ec] ss:$16 sps:$4 sm:$0xff]   ;;  %v4756_v5 = vld [vmem:[%s5954_s29 + $0x1e8] ss:$16 sps:$4 sm:$0xff]  }
 0x179   : > { %1690 = vmatprep.subr.bf16.mxu1 %v4671_v6  ;;  %v4759_v6 = vld [vmem:[%s5954_s29 + $0x3e8] ss:$16 sps:$4 sm:$0xff]  }
 0x17a   : > { %1600 = vmatmul.mubr.bf16.vlgmr.msra.gmra.mrb[0].mxu0 %v6064_v7 }
 0x17b   : > { %1641 = vmatmul.mubr.bf16.vlgmr.msra.gmra.mrb[0].mxu1 %v6066_v8  ;;  %1650 = vmatpush1.bf16.msra.mxu0 %v4666_v9  ;;  %v4764_v9 = vld [vmem:[%s5947_s4 + $0x4] ss:$16 sps:$4 sm:$0xff]  }
 0x17c   : > { %1691 = vmatpush1.bf16.msra.mxu1 %v4669_v10  ;;  %1651 = vmatprep.subr.bf16.mxu0 %v4674_v11  ;;  %v4767_v10 = vld [vmem:[%s5947_s4 + $0x204] ss:$16 sps:$4 sm:$0xff]   ;;  %v4762_v11 = vld [vmem:[%s5947_s4] ss:$16 sps:$4 sm:$0xff]  }
 0x17d   : > { %1692 = vmatprep.subr.bf16.mxu1 %v4677_v12  ;;  %1681 = vmatprep.mubr.bf16.mxu0 %v6040_v48  ;;  %v4731_v48 = vld [vmem:[%s5954_s29 + $0x34c] ss:$16 sps:$4 sm:$0xff]   ;;  %v4765_v12 = vld [vmem:[%s5947_s4 + $0x200] ss:$16 sps:$4 sm:$0xff]  }
 0x17e   : > { %1722 = vmatprep.mubr.bf16.mxu1 %v3987_v52  ;;  %v4737_v52 = vld [vmem:[%s5954_s29 + $0x36c] ss:$16 sps:$4 sm:$0xff]  }
 0x17f   : > { %1652 = vmatpush1.bf16.msra.mxu0 %v4672_v13  ;;  %v4770_v13 = vld [vmem:[%s5947_s4 + $0x24] ss:$16 sps:$4 sm:$0xff]  }
 0x180   : > { %1693 = vmatpush1.bf16.msra.mxu1 %v4675_v14  ;;  %1653 = vmatprep.subr.bf16.mxu0 %v4680_v15  ;;  %v4773_v14 = vld [vmem:[%s5947_s4 + $0x224] ss:$16 sps:$4 sm:$0xff]  }
 0x181   : > { %1694 = vmatprep.subr.bf16.mxu1 %v4683_v16  ;;  %v6140_v15 = vld [vmem:[%s5984_s8] sm:$0xff]  ;;  %v6143_v16 = vld [vmem:[%s5984_s8 + $0x8] sm:$0xff] }
 0x183   : > { %1654 = vmatpush1.bf16.msra.mxu0 %v4678_v17  ;;  %v6147_v17 = vcombine.high %v6140_v15, %v6140_v15 }
 0x184   : > { %1695 = vmatpush1.bf16.msra.mxu1 %v4681_v18  ;;  %1655 = vmatprep.subr.bf16.mxu0 %v4686_v19  ;;  %v6151_v18 = vcombine.high %v6143_v16, %v6143_v16  ;;  %v4768_v19 = vld [vmem:[%s5947_s4 + $0x20] ss:$16 sps:$4 sm:$0xff]  }
 0x185   : > { %1696 = vmatprep.subr.bf16.mxu1 %v4689_v20  ;;  %v4771_v20 = vld [vmem:[%s5947_s4 + $0x220] ss:$16 sps:$4 sm:$0xff]  }
 0x187   : > { %1656 = vmatpush1.bf16.msra.mxu0 %v4684_v21  ;;  %v4776_v21 = vld [vmem:[%s5947_s4 + $0x44] ss:$16 sps:$4 sm:$0xff]  }
 0x188   : > { %1697 = vmatpush1.bf16.msra.mxu1 %v4687_v22  ;;  %1657 = vmatprep.subr.bf16.mxu0 %v4692_v23  ;;  %v4779_v22 = vld [vmem:[%s5947_s4 + $0x244] ss:$16 sps:$4 sm:$0xff]  }
 0x189   : > { %1698 = vmatprep.subr.bf16.mxu1 %v4695_v24  ;;  %v4782_v23 = vld [vmem:[%s5947_s4 + $0x64] ss:$16 sps:$4 sm:$0xff]  }
 0x18a   : > { %v4785_v24 = vld [vmem:[%s5947_s4 + $0x264] ss:$16 sps:$4 sm:$0xff]  }
 0x18b   : > { %1658 = vmatpush1.bf16.msra.mxu0 %v4690_v25  ;;  %v4780_v25 = vld [vmem:[%s5947_s4 + $0x60] ss:$16 sps:$4 sm:$0xff]  }
 0x18c   : > { %1699 = vmatpush1.bf16.msra.mxu1 %v4693_v26  ;;  %1659 = vmatprep.subr.bf16.mxu0 %v4698_v27  ;;  %v4783_v26 = vld [vmem:[%s5947_s4 + $0x260] ss:$16 sps:$4 sm:$0xff]   ;;  %v4788_v27 = vld [vmem:[%s5947_s4 + $0x84] ss:$16 sps:$4 sm:$0xff]  }
 0x18d   : > { %1700 = vmatprep.subr.bf16.mxu1 %v4701_v28  ;;  %v4791_v28 = vld [vmem:[%s5947_s4 + $0x284] ss:$16 sps:$4 sm:$0xff]  }
 0x18f   : > { %1660 = vmatpush1.bf16.msra.mxu0 %v4696_v29  ;;  %v4786_v29 = vld [vmem:[%s5947_s4 + $0x80] ss:$16 sps:$4 sm:$0xff]  }
 0x190   : > { %1701 = vmatpush1.bf16.msra.mxu1 %v4699_v30  ;;  %1661 = vmatprep.subr.bf16.mxu0 %v4704_v31  ;;  %v4789_v30 = vld [vmem:[%s5947_s4 + $0x280] ss:$16 sps:$4 sm:$0xff]   ;;  %v4794_v31 = vld [vmem:[%s5947_s4 + $0xa4] ss:$16 sps:$4 sm:$0xff]  }
 0x191   : > { %1702 = vmatprep.subr.bf16.mxu1 %v4707_v32  ;;  %v4797_v32 = vld [vmem:[%s5947_s4 + $0x2a4] ss:$16 sps:$4 sm:$0xff]  }
 0x193   : > { %1662 = vmatpush1.bf16.msra.mxu0 %v4702_v33  ;;  %v4792_v33 = vld [vmem:[%s5947_s4 + $0xa0] ss:$16 sps:$4 sm:$0xff]  }
 0x194   : > { %1703 = vmatpush1.bf16.msra.mxu1 %v4705_v34  ;;  %1663 = vmatprep.subr.bf16.mxu0 %v4710_v35  ;;  %v4795_v34 = vld [vmem:[%s5947_s4 + $0x2a0] ss:$16 sps:$4 sm:$0xff]   ;;  %v4800_v35 = vld [vmem:[%s5947_s4 + $0xc4] ss:$16 sps:$4 sm:$0xff]  }
 0x195   : > { %1704 = vmatprep.subr.bf16.mxu1 %v4713_v36  ;;  %v4803_v36 = vld [vmem:[%s5947_s4 + $0x2c4] ss:$16 sps:$4 sm:$0xff]  }
 0x197   : > { %1664 = vmatpush1.bf16.msra.mxu0 %v4708_v37  ;;  %v4798_v37 = vld [vmem:[%s5947_s4 + $0xc0] ss:$16 sps:$4 sm:$0xff]  }
 0x198   : > { %1705 = vmatpush1.bf16.msra.mxu1 %v4711_v38  ;;  %1665 = vmatprep.subr.bf16.mxu0 %v4716_v39  ;;  %v4801_v38 = vld [vmem:[%s5947_s4 + $0x2c0] ss:$16 sps:$4 sm:$0xff]   ;;  %v4806_v39 = vld [vmem:[%s5947_s4 + $0xe4] ss:$16 sps:$4 sm:$0xff]  }
 0x199   : > { %1706 = vmatprep.subr.bf16.mxu1 %v4719_v40  ;;  %v4809_v40 = vld [vmem:[%s5947_s4 + $0x2e4] ss:$16 sps:$4 sm:$0xff]  }
 0x19b   : > { %1666 = vmatpush1.bf16.msra.mxu0 %v4714_v41  ;;  %v4804_v41 = vld [vmem:[%s5947_s4 + $0xe0] ss:$16 sps:$4 sm:$0xff]  }
 0x19c   : > { %1707 = vmatpush1.bf16.msra.mxu1 %v4717_v42  ;;  %1667 = vmatprep.subr.bf16.mxu0 %v4722_v43  ;;  %v4807_v42 = vld [vmem:[%s5947_s4 + $0x2e0] ss:$16 sps:$4 sm:$0xff]   ;;  %v4812_v43 = vld [vmem:[%s5947_s4 + $0x104] ss:$16 sps:$4 sm:$0xff]  }
 0x19d   : > { %1708 = vmatprep.subr.bf16.mxu1 %v4725_v44  ;;  %v4815_v44 = vld [vmem:[%s5947_s4 + $0x304] ss:$16 sps:$4 sm:$0xff]  }
 0x19f   : > { %1668 = vmatpush1.bf16.msra.mxu0 %v4720_v45  ;;  %v4810_v45 = vld [vmem:[%s5947_s4 + $0x100] ss:$16 sps:$4 sm:$0xff]  }
 0x1a0   : > { %1709 = vmatpush1.bf16.msra.mxu1 %v4723_v46  ;;  %1669 = vmatprep.subr.bf16.mxu0 %v4728_v47  ;;  %v4813_v46 = vld [vmem:[%s5947_s4 + $0x300] ss:$16 sps:$4 sm:$0xff]   ;;  %v4818_v47 = vld [vmem:[%s5947_s4 + $0x124] ss:$16 sps:$4 sm:$0xff]  }
 0x1a1   : > { %1710 = vmatprep.subr.bf16.mxu1 %v4731_v48  ;;  %v4821_v48 = vld [vmem:[%s5947_s4 + $0x324] ss:$16 sps:$4 sm:$0xff]  }
 0x1a3   : > { %1670 = vmatpush1.bf16.msra.mxu0 %v4726_v49  ;;  %v4816_v49 = vld [vmem:[%s5947_s4 + $0x120] ss:$16 sps:$4 sm:$0xff]  }
 0x1a4   : > { %1711 = vmatpush1.bf16.msra.mxu1 %v4729_v50  ;;  %1671 = vmatprep.subr.bf16.mxu0 %v4734_v51  ;;  %v4819_v50 = vld [vmem:[%s5947_s4 + $0x320] ss:$16 sps:$4 sm:$0xff]   ;;  %v4824_v51 = vld [vmem:[%s5947_s4 + $0x144] ss:$16 sps:$4 sm:$0xff]  }
 0x1a5   : > { %1712 = vmatprep.subr.bf16.mxu1 %v4737_v52  ;;  %v4827_v52 = vld [vmem:[%s5947_s4 + $0x344] ss:$16 sps:$4 sm:$0xff]  }
 0x1a7   : > { %1672 = vmatpush1.bf16.msra.mxu0 %v4732_v53  ;;  %v4822_v53 = vld [vmem:[%s5947_s4 + $0x140] ss:$16 sps:$4 sm:$0xff]  }
 0x1a8   : > { %1713 = vmatpush1.bf16.msra.mxu1 %v4735_v54  ;;  %1673 = vmatprep.subr.bf16.mxu0 %v4740_v55  ;;  %v4825_v54 = vld [vmem:[%s5947_s4 + $0x340] ss:$16 sps:$4 sm:$0xff]   ;;  %v4830_v55 = vld [vmem:[%s5947_s4 + $0x164] ss:$16 sps:$4 sm:$0xff]  }
 0x1a9   : > { %1714 = vmatprep.subr.bf16.mxu1 %v4743_v56  ;;  %v4833_v56 = vld [vmem:[%s5947_s4 + $0x364] ss:$16 sps:$4 sm:$0xff]  }
 0x1ab   : > { %1674 = vmatpush1.bf16.msra.mxu0 %v4738_v57  ;;  %v4828_v57 = vld [vmem:[%s5947_s4 + $0x160] ss:$16 sps:$4 sm:$0xff]  }
 0x1ac   : > { %1715 = vmatpush1.bf16.msra.mxu1 %v4741_v58  ;;  %1675 = vmatprep.subr.bf16.mxu0 %v4746_v59  ;;  %v4831_v58 = vld [vmem:[%s5947_s4 + $0x360] ss:$16 sps:$4 sm:$0xff]   ;;  %v4836_v59 = vld [vmem:[%s5947_s4 + $0x184] ss:$16 sps:$4 sm:$0xff]  }
 0x1ad   : > { %1716 = vmatprep.subr.bf16.mxu1 %v4749_v60  ;;  %v4839_v60 = vld [vmem:[%s5947_s4 + $0x384] ss:$16 sps:$4 sm:$0xff]  }
 0x1af   : > { %1676 = vmatpush1.bf16.msra.mxu0 %v4744_v61  ;;  %v4834_v61 = vld [vmem:[%s5947_s4 + $0x180] ss:$16 sps:$4 sm:$0xff]  }
 0x1b0   : > { %1717 = vmatpush1.bf16.msra.mxu1 %v4747_v62  ;;  %1677 = vmatprep.subr.bf16.mxu0 %v4752_v63  ;;  %v4837_v62 = vld [vmem:[%s5947_s4 + $0x380] ss:$16 sps:$4 sm:$0xff]   ;;  %v4842_v63 = vld [vmem:[%s5947_s4 + $0x1a4] ss:$16 sps:$4 sm:$0xff]  }
 0x1b1   : > { %1718 = vmatprep.subr.bf16.mxu1 %v4755_v0  ;;  %v4845_v0 = vld [vmem:[%s5947_s4 + $0x3a4] ss:$16 sps:$4 sm:$0xff]  }
 0x1b3   : > { %1678 = vmatpush1.bf16.msra.mxu0 %v4750_v1  ;;  %v4840_v1 = vld [vmem:[%s5947_s4 + $0x1a0] ss:$16 sps:$4 sm:$0xff]  }
 0x1b4   : > { %1719 = vmatpush1.bf16.msra.mxu1 %v4753_v2  ;;  %1679 = vmatprep.subr.bf16.mxu0 %v4758_v3  ;;  %v4843_v2 = vld [vmem:[%s5947_s4 + $0x3a0] ss:$16 sps:$4 sm:$0xff]   ;;  %v4848_v3 = vld [vmem:[%s5947_s4 + $0x1c4] ss:$16 sps:$4 sm:$0xff]  }
 0x1b5   : > { %1720 = vmatprep.subr.bf16.mxu1 %v4761_v4  ;;  %v4851_v4 = vld [vmem:[%s5947_s4 + $0x3c4] ss:$16 sps:$4 sm:$0xff]  }
 0x1b7   : > { %1680 = vmatpush1.bf16.msra.mxu0 %v4756_v5  ;;  %v4846_v5 = vld [vmem:[%s5947_s4 + $0x1c0] ss:$16 sps:$4 sm:$0xff]  }
 0x1b8   : > { %1721 = vmatpush1.bf16.msra.mxu1 %v4759_v6  ;;  %2385 = vmatprep.subr.bf16.mxu0 %v4764_v9  ;;  %v4849_v6 = vld [vmem:[%s5947_s4 + $0x3c0] ss:$16 sps:$4 sm:$0xff]   ;;  %v4854_v9 = vld [vmem:[%s5947_s4 + $0x1e4] ss:$16 sps:$4 sm:$0xff]  }
 0x1b9   : > { %2426 = vmatprep.subr.bf16.mxu1 %v4767_v10  ;;  %v4857_v10 = vld [vmem:[%s5947_s4 + $0x3e4] ss:$16 sps:$4 sm:$0xff]  }
 0x1ba   : > { %1682 = vmatmul.mubr.bf16.vlgmr.msra.gmra.mrb[4].mxu0 %v6064_v7  ;;  %v4774_v7 = vld [vmem:[%s5947_s4 + $0x40] ss:$16 sps:$4 sm:$0xff]  }
 0x1bb   : > { %1723 = vmatmul.mubr.bf16.vlgmr.msra.gmra.mrb[4].mxu1 %v6066_v8  ;;  %2386 = vmatpush1.bf16.msra.mxu0 %v4762_v11  ;;  %v4777_v8 = vld [vmem:[%s5947_s4 + $0x240] ss:$16 sps:$4 sm:$0xff]  }
 0x1bc   : > { %2427 = vmatpush1.bf16.msra.mxu1 %v4765_v12  ;;  %2387 = vmatprep.subr.bf16.mxu0 %v4770_v13  ;;  %v4852_v11 = vld [vmem:[%s5947_s4 + $0x1e0] ss:$16 sps:$4 sm:$0xff]   ;;  %v4864_v13 = vld [vmem:[%s5947_s4 + $0xc] ss:$16 sps:$4 sm:$0xff]  }
 0x1bd   : > { %2428 = vmatprep.subr.bf16.mxu1 %v4773_v14  ;;  %2417 = vmatprep.mubr.bf16.mxu0 %v6147_v17  ;;  %v4855_v12 = vld [vmem:[%s5947_s4 + $0x3e0] ss:$16 sps:$4 sm:$0xff]   ;;  %v4867_v14 = vld [vmem:[%s5947_s4 + $0x20c] ss:$16 sps:$4 sm:$0xff]  }
 0x1be   : > { %2458 = vmatprep.mubr.bf16.mxu1 %v6151_v18 }
 0x1bf   : > { %2388 = vmatpush1.bf16.msra.mxu0 %v4768_v19  ;;  %v6219_v19 = vcombine.low %v6140_v15, %v6140_v15  ;;  %v4868_v15 = vld [vmem:[%s5947_s4 + $0x28] ss:$16 sps:$4 sm:$0xff]  }
 0x1c0   : > { %2429 = vmatpush1.bf16.msra.mxu1 %v4771_v20  ;;  %2389 = vmatprep.subr.bf16.mxu0 %v4776_v21  ;;  %v6223_v20 = vcombine.low %v6143_v16, %v6143_v16  ;;  %v4862_v21 = vld [vmem:[%s5947_s4 + $0x8] ss:$16 sps:$4 sm:$0xff]  }
 0x1c1   : > { %2430 = vmatprep.subr.bf16.mxu1 %v4779_v22  ;;  %v4865_v22 = vld [vmem:[%s5947_s4 + $0x208] ss:$16 sps:$4 sm:$0xff]  }
 0x1c2   : > { %v4871_v16 = vld [vmem:[%s5947_s4 + $0x228] ss:$16 sps:$4 sm:$0xff]  }
 0x1c3   : > { %2390 = vmatpush1.bf16.msra.mxu0 %v4774_v7  ;;  %v4870_v7 = vld [vmem:[%s5947_s4 + $0x2c] ss:$16 sps:$4 sm:$0xff]  }
 0x1c4   : > { %2431 = vmatpush1.bf16.msra.mxu1 %v4777_v8  ;;  %2391 = vmatprep.subr.bf16.mxu0 %v4782_v23  ;;  %v4873_v8 = vld [vmem:[%s5947_s4 + $0x22c] ss:$16 sps:$4 sm:$0xff]  }
 0x1c5   : > { %2432 = vmatprep.subr.bf16.mxu1 %v4785_v24  ;;  %v4876_v23 = vld [vmem:[%s5947_s4 + $0x4c] ss:$16 sps:$4 sm:$0xff]  }
 0x1c6   : > { %v4879_v24 = vld [vmem:[%s5947_s4 + $0x24c] ss:$16 sps:$4 sm:$0xff]  }
 0x1c7   : > { %2392 = vmatpush1.bf16.msra.mxu0 %v4780_v25  ;;  %v4874_v25 = vld [vmem:[%s5947_s4 + $0x48] ss:$16 sps:$4 sm:$0xff]  }
 0x1c8   : > { %2433 = vmatpush1.bf16.msra.mxu1 %v4783_v26  ;;  %2393 = vmatprep.subr.bf16.mxu0 %v4788_v27  ;;  %v4877_v26 = vld [vmem:[%s5947_s4 + $0x248] ss:$16 sps:$4 sm:$0xff]   ;;  %v4882_v27 = vld [vmem:[%s5947_s4 + $0x6c] ss:$16 sps:$4 sm:$0xff]  }
 0x1c9   : > { %2434 = vmatprep.subr.bf16.mxu1 %v4791_v28  ;;  %v4885_v28 = vld [vmem:[%s5947_s4 + $0x26c] ss:$16 sps:$4 sm:$0xff]  }
 0x1cb   : > { %2394 = vmatpush1.bf16.msra.mxu0 %v4786_v29  ;;  %v4880_v29 = vld [vmem:[%s5947_s4 + $0x68] ss:$16 sps:$4 sm:$0xff]  }
 0x1cc   : > { %2435 = vmatpush1.bf16.msra.mxu1 %v4789_v30  ;;  %2395 = vmatprep.subr.bf16.mxu0 %v4794_v31  ;;  %v4891_v30 = vld [vmem:[%s5947_s4 + $0x28c] ss:$16 sps:$4 sm:$0xff]   ;;  %v4886_v31 = vld [vmem:[%s5947_s4 + $0x88] ss:$16 sps:$4 sm:$0xff]  }
 0x1cd   : > { %2436 = vmatprep.subr.bf16.mxu1 %v4797_v32  ;;  %v4889_v32 = vld [vmem:[%s5947_s4 + $0x288] ss:$16 sps:$4 sm:$0xff]  }
 0x1cf   : > { %2396 = vmatpush1.bf16.msra.mxu0 %v4792_v33  ;;  %v4894_v33 = vld [vmem:[%s5947_s4 + $0xac] ss:$16 sps:$4 sm:$0xff]  }
 0x1d0   : > { %2437 = vmatpush1.bf16.msra.mxu1 %v4795_v34  ;;  %2397 = vmatprep.subr.bf16.mxu0 %v4800_v35  ;;  %v4897_v34 = vld [vmem:[%s5947_s4 + $0x2ac] ss:$16 sps:$4 sm:$0xff]   ;;  %v4892_v35 = vld [vmem:[%s5947_s4 + $0xa8] ss:$16 sps:$4 sm:$0xff]  }
 0x1d1   : > { %2438 = vmatprep.subr.bf16.mxu1 %v4803_v36  ;;  %v4895_v36 = vld [vmem:[%s5947_s4 + $0x2a8] ss:$16 sps:$4 sm:$0xff]  }
 0x1d3   : > { %2398 = vmatpush1.bf16.msra.mxu0 %v4798_v37  ;;  %v4900_v37 = vld [vmem:[%s5947_s4 + $0xcc] ss:$16 sps:$4 sm:$0xff]  }
 0x1d4   : > { %2439 = vmatpush1.bf16.msra.mxu1 %v4801_v38  ;;  %2399 = vmatprep.subr.bf16.mxu0 %v4806_v39  ;;  %v4903_v38 = vld [vmem:[%s5947_s4 + $0x2cc] ss:$16 sps:$4 sm:$0xff]   ;;  %v4898_v39 = vld [vmem:[%s5947_s4 + $0xc8] ss:$16 sps:$4 sm:$0xff]  }
 0x1d5   : > { %2440 = vmatprep.subr.bf16.mxu1 %v4809_v40  ;;  %v4901_v40 = vld [vmem:[%s5947_s4 + $0x2c8] ss:$16 sps:$4 sm:$0xff]  }
 0x1d7   : > { %2400 = vmatpush1.bf16.msra.mxu0 %v4804_v41  ;;  %v4906_v41 = vld [vmem:[%s5947_s4 + $0xec] ss:$16 sps:$4 sm:$0xff]  }
 0x1d8   : > { %2441 = vmatpush1.bf16.msra.mxu1 %v4807_v42  ;;  %2401 = vmatprep.subr.bf16.mxu0 %v4812_v43  ;;  %v4909_v42 = vld [vmem:[%s5947_s4 + $0x2ec] ss:$16 sps:$4 sm:$0xff]   ;;  %v4904_v43 = vld [vmem:[%s5947_s4 + $0xe8] ss:$16 sps:$4 sm:$0xff]  }
 0x1d9   : > { %2442 = vmatprep.subr.bf16.mxu1 %v4815_v44  ;;  %v4907_v44 = vld [vmem:[%s5947_s4 + $0x2e8] ss:$16 sps:$4 sm:$0xff]  }
 0x1db   : > { %2402 = vmatpush1.bf16.msra.mxu0 %v4810_v45  ;;  %v4912_v45 = vld [vmem:[%s5947_s4 + $0x10c] ss:$16 sps:$4 sm:$0xff]  }
 0x1dc   : > { %2443 = vmatpush1.bf16.msra.mxu1 %v4813_v46  ;;  %2403 = vmatprep.subr.bf16.mxu0 %v4818_v47  ;;  %v4915_v46 = vld [vmem:[%s5947_s4 + $0x30c] ss:$16 sps:$4 sm:$0xff]   ;;  %v4910_v47 = vld [vmem:[%s5947_s4 + $0x108] ss:$16 sps:$4 sm:$0xff]  }
 0x1dd   : > { %2444 = vmatprep.subr.bf16.mxu1 %v4821_v48  ;;  %v4913_v48 = vld [vmem:[%s5947_s4 + $0x308] ss:$16 sps:$4 sm:$0xff]  }
 0x1df   : > { %2404 = vmatpush1.bf16.msra.mxu0 %v4816_v49  ;;  %v4918_v49 = vld [vmem:[%s5947_s4 + $0x12c] ss:$16 sps:$4 sm:$0xff]  }
 0x1e0   : > { %2445 = vmatpush1.bf16.msra.mxu1 %v4819_v50  ;;  %2405 = vmatprep.subr.bf16.mxu0 %v4824_v51  ;;  %v4921_v50 = vld [vmem:[%s5947_s4 + $0x32c] ss:$16 sps:$4 sm:$0xff]   ;;  %v4916_v51 = vld [vmem:[%s5947_s4 + $0x128] ss:$16 sps:$4 sm:$0xff]  }
 0x1e1   : > { %2446 = vmatprep.subr.bf16.mxu1 %v4827_v52  ;;  %v4919_v52 = vld [vmem:[%s5947_s4 + $0x328] ss:$16 sps:$4 sm:$0xff]  }
 0x1e3   : > { %2406 = vmatpush1.bf16.msra.mxu0 %v4822_v53  ;;  %v4924_v53 = vld [vmem:[%s5947_s4 + $0x14c] ss:$16 sps:$4 sm:$0xff]  }
 0x1e4   : > { %2447 = vmatpush1.bf16.msra.mxu1 %v4825_v54  ;;  %2407 = vmatprep.subr.bf16.mxu0 %v4830_v55  ;;  %v4927_v54 = vld [vmem:[%s5947_s4 + $0x34c] ss:$16 sps:$4 sm:$0xff]   ;;  %v4922_v55 = vld [vmem:[%s5947_s4 + $0x148] ss:$16 sps:$4 sm:$0xff]  }
 0x1e5   : > { %2448 = vmatprep.subr.bf16.mxu1 %v4833_v56  ;;  %v4925_v56 = vld [vmem:[%s5947_s4 + $0x348] ss:$16 sps:$4 sm:$0xff]  }
 0x1e7   : > { %2408 = vmatpush1.bf16.msra.mxu0 %v4828_v57  ;;  %v4930_v57 = vld [vmem:[%s5947_s4 + $0x16c] ss:$16 sps:$4 sm:$0xff]  }
 0x1e8   : > { %2449 = vmatpush1.bf16.msra.mxu1 %v4831_v58  ;;  %2409 = vmatprep.subr.bf16.mxu0 %v4836_v59  ;;  %v4933_v58 = vld [vmem:[%s5947_s4 + $0x36c] ss:$16 sps:$4 sm:$0xff]   ;;  %v4928_v59 = vld [vmem:[%s5947_s4 + $0x168] ss:$16 sps:$4 sm:$0xff]  }
 0x1e9   : > { %2450 = vmatprep.subr.bf16.mxu1 %v4839_v60  ;;  %v4931_v60 = vld [vmem:[%s5947_s4 + $0x368] ss:$16 sps:$4 sm:$0xff]  }
 0x1eb   : > { %2410 = vmatpush1.bf16.msra.mxu0 %v4834_v61  ;;  %v4936_v61 = vld [vmem:[%s5947_s4 + $0x18c] ss:$16 sps:$4 sm:$0xff]  }
 0x1ec   : > { %2451 = vmatpush1.bf16.msra.mxu1 %v4837_v62  ;;  %2411 = vmatprep.subr.bf16.mxu0 %v4842_v63  ;;  %v4939_v62 = vld [vmem:[%s5947_s4 + $0x38c] ss:$16 sps:$4 sm:$0xff]   ;;  %v4934_v63 = vld [vmem:[%s5947_s4 + $0x188] ss:$16 sps:$4 sm:$0xff]  }
 0x1ed   : > { %2452 = vmatprep.subr.bf16.mxu1 %v4845_v0  ;;  %v4937_v0 = vld [vmem:[%s5947_s4 + $0x388] ss:$16 sps:$4 sm:$0xff]  }
 0x1ef   : > { %2412 = vmatpush1.bf16.msra.mxu0 %v4840_v1  ;;  %v4942_v1 = vld [vmem:[%s5947_s4 + $0x1ac] ss:$16 sps:$4 sm:$0xff]  }
 0x1f0   : > { %2453 = vmatpush1.bf16.msra.mxu1 %v4843_v2  ;;  %2413 = vmatprep.subr.bf16.mxu0 %v4848_v3  ;;  %v4945_v2 = vld [vmem:[%s5947_s4 + $0x3ac] ss:$16 sps:$4 sm:$0xff]   ;;  %v4940_v3 = vld [vmem:[%s5947_s4 + $0x1a8] ss:$16 sps:$4 sm:$0xff]  }
 0x1f1   : > { %2454 = vmatprep.subr.bf16.mxu1 %v4851_v4  ;;  %v4943_v4 = vld [vmem:[%s5947_s4 + $0x3a8] ss:$16 sps:$4 sm:$0xff]  }
 0x1f3   : > { %2414 = vmatpush1.bf16.msra.mxu0 %v4846_v5  ;;  %v4948_v5 = vld [vmem:[%s5947_s4 + $0x1cc] ss:$16 sps:$4 sm:$0xff]  }
 0x1f4   : > { %2455 = vmatpush1.bf16.msra.mxu1 %v4849_v6  ;;  %2415 = vmatprep.subr.bf16.mxu0 %v4854_v9  ;;  %v4951_v6 = vld [vmem:[%s5947_s4 + $0x3cc] ss:$16 sps:$4 sm:$0xff]   ;;  %v4946_v9 = vld [vmem:[%s5947_s4 + $0x1c8] ss:$16 sps:$4 sm:$0xff]  }
 0x1f5   : > { %2456 = vmatprep.subr.bf16.mxu1 %v4857_v10  ;;  %v4949_v10 = vld [vmem:[%s5947_s4 + $0x3c8] ss:$16 sps:$4 sm:$0xff]  }
 0x1f7   : > { %2416 = vmatpush1.bf16.msra.mxu0 %v4852_v11  ;;  %v4954_v11 = vld [vmem:[%s5947_s4 + $0x1ec] ss:$16 sps:$4 sm:$0xff]  }
 0x1f8   : > { %2457 = vmatpush1.bf16.msra.mxu1 %v4855_v12  ;;  %2467 = vmatprep.subr.bf16.mxu0 %v4864_v13  ;;  %v4957_v12 = vld [vmem:[%s5947_s4 + $0x3ec] ss:$16 sps:$4 sm:$0xff]   ;;  %v4952_v13 = vld [vmem:[%s5947_s4 + $0x1e8] ss:$16 sps:$4 sm:$0xff]  }
 0x1f9   : > { %2508 = vmatprep.subr.bf16.mxu1 %v4867_v14  ;;  %v4955_v14 = vld [vmem:[%s5947_s4 + $0x3e8] ss:$16 sps:$4 sm:$0xff]  }
 0x1fa   : > { %2418 = vmatmul.mubr.bf16.vlgmr.msra.gmra.mrb[8].mxu0 %v6219_v19 }
 0x1fb   : > { %2459 = vmatmul.mubr.bf16.vlgmr.msra.gmra.mrb[8].mxu1 %v6223_v20  ;;  %2468 = vmatpush1.bf16.msra.mxu0 %v4862_v21 }
 0x1fc   : > { %2509 = vmatpush1.bf16.msra.mxu1 %v4865_v22  ;;  %2469 = vmatprep.subr.bf16.mxu0 %v4870_v7 }
 0x1fd   : > { %2510 = vmatprep.subr.bf16.mxu1 %v4873_v8  ;;  %2499 = vmatprep.mubr.bf16.mxu0 %v6147_v17  ;;  %v4883_v17 = vld [vmem:[%s5947_s4 + $0x268] ss:$16 sps:$4 sm:$0xff]  }
 0x1fe   : > { %2540 = vmatprep.mubr.bf16.mxu1 %v6151_v18  ;;  %v4888_v18 = vld [vmem:[%s5947_s4 + $0x8c] ss:$16 sps:$4 sm:$0xff]  }
 0x1ff   : > { %2470 = vmatpush1.bf16.msra.mxu0 %v4868_v15 }
 0x200   : > { %2511 = vmatpush1.bf16.msra.mxu1 %v4871_v16  ;;  %2471 = vmatprep.subr.bf16.mxu0 %v4876_v23 }
 0x201   : > { %2512 = vmatprep.subr.bf16.mxu1 %v4879_v24 }
 0x203   : > { %2472 = vmatpush1.bf16.msra.mxu0 %v4874_v25 }
 0x204   : > { %2513 = vmatpush1.bf16.msra.mxu1 %v4877_v26  ;;  %2473 = vmatprep.subr.bf16.mxu0 %v4882_v27 }
 0x205   : > { %2514 = vmatprep.subr.bf16.mxu1 %v4885_v28 }
 0x207   : > { %2474 = vmatpush1.bf16.msra.mxu0 %v4880_v29 }
 0x208   : > { %2515 = vmatpush1.bf16.msra.mxu1 %v4883_v17  ;;  %2475 = vmatprep.subr.bf16.mxu0 %v4888_v18 }
 0x209   : > { %2516 = vmatprep.subr.bf16.mxu1 %v4891_v30 }
 0x20b   : > { %2476 = vmatpush1.bf16.msra.mxu0 %v4886_v31 }
 0x20c   : > { %2517 = vmatpush1.bf16.msra.mxu1 %v4889_v32  ;;  %2477 = vmatprep.subr.bf16.mxu0 %v4894_v33 }
 0x20d   : > { %2518 = vmatprep.subr.bf16.mxu1 %v4897_v34 }
 0x20f   : > { %2478 = vmatpush1.bf16.msra.mxu0 %v4892_v35 }
 0x210   : > { %2519 = vmatpush1.bf16.msra.mxu1 %v4895_v36  ;;  %2479 = vmatprep.subr.bf16.mxu0 %v4900_v37 }
 0x211   : > { %2520 = vmatprep.subr.bf16.mxu1 %v4903_v38  ;;  %v649_v38 = vld [vmem:[#allocation2] sm:$0xff] }
 0x213   : > { %2480 = vmatpush1.bf16.msra.mxu0 %v4898_v39 }
 0x214   : > { %2521 = vmatpush1.bf16.msra.mxu1 %v4901_v40  ;;  %2481 = vmatprep.subr.bf16.mxu0 %v4906_v41 }
 0x215   : > { %2522 = vmatprep.subr.bf16.mxu1 %v4909_v42 }
 0x217   : > { %2482 = vmatpush1.bf16.msra.mxu0 %v4904_v43  ;;  %v650_v43 = vld [vmem:[#allocation2 + $0x8] sm:$0xff] }
 0x218   : > { %2523 = vmatpush1.bf16.msra.mxu1 %v4907_v44  ;;  %2483 = vmatprep.subr.bf16.mxu0 %v4912_v45 }
 0x219   : > { %2524 = vmatprep.subr.bf16.mxu1 %v4915_v46 }
 0x21b   : > { %2484 = vmatpush1.bf16.msra.mxu0 %v4910_v47 }
 0x21c   : > { %2525 = vmatpush1.bf16.msra.mxu1 %v4913_v48  ;;  %2485 = vmatprep.subr.bf16.mxu0 %v4918_v49 }
 0x21d   : > { %2526 = vmatprep.subr.bf16.mxu1 %v4921_v50 }
 0x21f   : > { %2486 = vmatpush1.bf16.msra.mxu0 %v4916_v51 }
 0x220   : > { %2527 = vmatpush1.bf16.msra.mxu1 %v4919_v52  ;;  %2487 = vmatprep.subr.bf16.mxu0 %v4924_v53 }
 0x221   : > { %2528 = vmatprep.subr.bf16.mxu1 %v4927_v54  ;;  %v651_v54 = vld [vmem:[#allocation2 + $0x10] sm:$0xff] }
 0x223   : > { %2488 = vmatpush1.bf16.msra.mxu0 %v4922_v55 }
 0x224   : > { %2529 = vmatpush1.bf16.msra.mxu1 %v4925_v56  ;;  %2489 = vmatprep.subr.bf16.mxu0 %v4930_v57 }
 0x225   : > { %2530 = vmatprep.subr.bf16.mxu1 %v4933_v58 }
 0x227   : > { %2490 = vmatpush1.bf16.msra.mxu0 %v4928_v59  ;;  %v652_v59 = vld [vmem:[#allocation2 + $0x18] sm:$0xff] }
 0x228   : > { %2531 = vmatpush1.bf16.msra.mxu1 %v4931_v60  ;;  %2491 = vmatprep.subr.bf16.mxu0 %v4936_v61 }
 0x229   : > { %2532 = vmatprep.subr.bf16.mxu1 %v4939_v62 }
 0x22b   : > { %2492 = vmatpush1.bf16.msra.mxu0 %v4934_v63 }
 0x22c   : > { %2533 = vmatpush1.bf16.msra.mxu1 %v4937_v0  ;;  %2493 = vmatprep.subr.bf16.mxu0 %v4942_v1  ;;  %v4958_v1 = vld [vmem:[%s6576_s6 + $0x4] ss:$8 sps:$4 sm:$0xff] (!%p4248_p5)  }
 0x22d   : > { %2534 = vmatprep.subr.bf16.mxu1 %v4945_v2  ;;  %v4960_v2 = vld [vmem:[%s6576_s6] ss:$8 sps:$4 sm:$0xff] (!%p4248_p5)  }
 0x22f   : > { %2494 = vmatpush1.bf16.msra.mxu0 %v4940_v3  ;;  %v4961_v3 = vld [vmem:[%s6576_s6 + $0x14] ss:$8 sps:$4 sm:$0xff] (!%p4248_p5)  }
 0x230   : > { %2535 = vmatpush1.bf16.msra.mxu1 %v4943_v4  ;;  %2495 = vmatprep.subr.bf16.mxu0 %v4948_v5  ;;  %v4963_v4 = vld [vmem:[%s6576_s6 + $0x10] ss:$8 sps:$4 sm:$0xff] (!%p4248_p5)   ;;  %v4964_v5 = vld [vmem:[%s6576_s6 + $0x24] ss:$8 sps:$4 sm:$0xff] (!%p4248_p5)  }
 0x231   : > { %2536 = vmatprep.subr.bf16.mxu1 %v4951_v6  ;;  %v4966_v6 = vld [vmem:[%s6576_s6 + $0x20] ss:$8 sps:$4 sm:$0xff] (!%p4248_p5)  }
 0x233   : > { %2496 = vmatpush1.bf16.msra.mxu0 %v4946_v9  ;;  %v4967_v9 = vld [vmem:[%s6576_s6 + $0x34] ss:$8 sps:$4 sm:$0xff] (!%p4248_p5)  }
 0x234   : > { %2537 = vmatpush1.bf16.msra.mxu1 %v4949_v10  ;;  %2497 = vmatprep.subr.bf16.mxu0 %v4954_v11  ;;  %v2567_v10 = vlaneseq (!%p4248_p5)  ;;  %v4969_v11 = vld [vmem:[%s6576_s6 + $0x30] ss:$8 sps:$4 sm:$0xff] (!%p4248_p5)  }
 0x235   : > { %2538 = vmatprep.subr.bf16.mxu1 %v4957_v12  ;;  %v4970_v12 = vld [vmem:[%s6576_s6 + $0x44] ss:$8 sps:$4 sm:$0xff] (!%p4248_p5)  }
 0x237   : > { %2498 = vmatpush1.bf16.msra.mxu0 %v4952_v13  ;;  %v6321_v13 = vshrl.u32 (!%p4248_p5), %v2567_v10, 7  ;;  %v5075_v10 = vld [vmem:[#allocation10 + $0x74] ss:$8 sps:$4 sm:$0xff] (!%p4248_p5)  }
 0x238   : > { %2539 = vmatpush1.bf16.msra.mxu1 %v4955_v14  ;;  %2991 = vmatprep.subr.bf16.mxu0 (!%p4248_p5), %v4958_v1  ;;  %v4972_v14 = vld [vmem:[%s6576_s6 + $0x40] ss:$8 sps:$4 sm:$0xff] (!%p4248_p5)   ;;  %v5011_v1 = vld [vmem:[%s6576_s6 + $0x114] ss:$8 sps:$4 sm:$0xff] (!%p4248_p5)  }
 0x23a   : > { %2500 = vmatmul.mubr.bf16.vlgmr.msra.gmra.mrb[12].mxu0 %v6219_v19 }
 0x23b   : > { %2541 = vmatmul.mubr.bf16.vlgmr.msra.gmra.mrb[12].mxu1 %v6223_v20  ;;  %2992 = vmatpush1.bf16.msra.mxu0 (!%p4248_p5), %v4960_v2  ;;  %v5071_v2 = vld [vmem:[#allocation10 + $0x50] ss:$8 sps:$4 sm:$0xff] (!%p4248_p5)  }
 0x23c   : > { %2993 = vmatprep.subr.bf16.mxu0 (!%p4248_p5), %v4961_v3 }
 0x23f   : > { %2994 = vmatpush1.bf16.msra.mxu0 (!%p4248_p5), %v4963_v4  ;;  %v5072_v4 = vld [vmem:[#allocation10 + $0x64] ss:$8 sps:$4 sm:$0xff] (!%p4248_p5)  }
 0x240   : > { %2995 = vmatprep.subr.bf16.mxu0 (!%p4248_p5), %v4964_v5  ;;  %v5009_v5 = vld [vmem:[%s6576_s6 + $0x110] ss:$8 sps:$4 sm:$0xff] (!%p4248_p5)  }
 0x243   : > { %2996 = vmatpush1.bf16.msra.mxu0 (!%p4248_p5), %v4966_v6  ;;  %v5014_v6 = vld [vmem:[%s6576_s6 + $0x124] ss:$8 sps:$4 sm:$0xff] (!%p4248_p5)  }
 0x244   : > { %2997 = vmatprep.subr.bf16.mxu0 (!%p4248_p5), %v4967_v9  ;;  %v5074_v9 = vld [vmem:[#allocation10 + $0x60] ss:$8 sps:$4 sm:$0xff] (!%p4248_p5)  }
 0x247   : > { %2998 = vmatpush1.bf16.msra.mxu0 (!%p4248_p5), %v4969_v11  ;;  %v5012_v11 = vld [vmem:[%s6576_s6 + $0x120] ss:$8 sps:$4 sm:$0xff] (!%p4248_p5)  }
 0x248   : > { %2999 = vmatprep.subr.bf16.mxu0 (!%p4248_p5), %v4970_v12  ;;  %v5017_v12 = vld [vmem:[%s6576_s6 + $0x134] ss:$8 sps:$4 sm:$0xff] (!%p4248_p5)  }
 0x24b   : > { %3000 = vmatpush1.bf16.msra.mxu0 (!%p4248_p5), %v4972_v14  ;;  %v5020_v14 = vld [vmem:[%s6576_s6 + $0x144] ss:$8 sps:$4 sm:$0xff] (!%p4248_p5)  }
 0x24d   : > { %v1601_v21 = vpop.f32.mrb[0].mxu0 }
 0x24e   : > { %v1642_v22 = vpop.f32.mrb[0].mxu1  ;;  %v1603_v8 = vpop.f32.mrb[1].mxu0 }
 0x24f   : > { %v1643_v7 = vadd.f32 %v1642_v22, %v1601_v21  ;;  %v1644_v15 = vpop.f32.mrb[1].mxu1  ;;  %v1605_v23 = vpop.f32.mrb[2].mxu0  ;;  %v4973_v21 = vld [vmem:[%s6576_s6 + $0x54] ss:$8 sps:$4 sm:$0xff] (!%p4248_p5)   ;;  %v6330_v22 = vsub.s32 (!%p4248_p5), 1, %v6321_v13 }
 0x250   : > { %v1645_v16 = vadd.f32 %v1644_v15, %v1603_v8  ;;  %v1646_v24 = vpop.f32.mrb[2].mxu1  ;;  %v1606_v25 = vpop.f32.mrb[3].mxu0  ;;  %v4975_v8 = vld [vmem:[%s6576_s6 + $0x50] ss:$8 sps:$4 sm:$0xff] (!%p4248_p5)   ;;  %3001 = vmatprep.subr.bf16.mxu0 (!%p4248_p5), %v4973_v21  ;;  %v4976_v15 = vld [vmem:[%s6576_s6 + $0x64] ss:$8 sps:$4 sm:$0xff] (!%p4248_p5)  }
 0x251   : > { %v1647_v26 = vpop.f32.mrb[3].mxu1  ;;  %v6339_v23 = vld [vmem:[#allocation7] sm:$0xf] (!%p4248_p5)  ;;  %3002 = vmatpush1.bf16.msra.mxu0 (!%p4248_p5), %v4975_v8  ;;  %v5021_v8 = vld [vmem:[%s6576_s6 + $0x150] ss:$8 sps:$4 sm:$0xff] (!%p4248_p5)  }
 0x252   : > { %v2574_v24 = vrot.slane (!%p4248_p5), %v6339_v23, %v6330_v22  ;;  %v4978_v26 = vld [vmem:[%s6576_s6 + $0x60] ss:$8 sps:$4 sm:$0xff] (!%p4248_p5)   ;;  %3003 = vmatprep.subr.bf16.mxu0 (!%p4248_p5), %v4976_v15  ;;  %v5026_v15 = vld [vmem:[%s6576_s6 + $0x164] ss:$8 sps:$4 sm:$0xff] (!%p4248_p5)  }
 0x253   : > { %v5018_v21 = vld [vmem:[%s6576_s6 + $0x140] ss:$8 sps:$4 sm:$0xff] (!%p4248_p5)  }
 0x255   : > { %3004 = vmatpush1.bf16.msra.mxu0 (!%p4248_p5), %v4978_v26  ;;  %v5032_v26 = vld [vmem:[%s6576_s6 + $0x184] ss:$8 sps:$4 sm:$0xff] (!%p4248_p5)  }
 0x28d   : > { %v1683_v27 = vpop.f32.mrb[4].mxu0 }
 0x28e   : > { %v1724_v28 = vpop.f32.mrb[4].mxu1  ;;  %v1685_v17 = vpop.f32.mrb[5].mxu0 }
 0x28f   : > { %v1725_v29 = vadd.f32 %v1724_v28, %v1683_v27  ;;  %v1726_v18 = vpop.f32.mrb[5].mxu1  ;;  %v1687_v31 = vpop.f32.mrb[6].mxu0  ;;  %v4979_v27 = vld [vmem:[%s6576_s6 + $0x74] ss:$8 sps:$4 sm:$0xff] (!%p4248_p5)  }
 0x290   : > { %v1727_v30 = vadd.f32 %v1726_v18, %v1685_v17  ;;  %v1728_v19 = vpop.f32.mrb[6].mxu1  ;;  %v1688_v32 = vpop.f32.mrb[7].mxu0  ;;  %v4981_v17 = vld [vmem:[%s6576_s6 + $0x70] ss:$8 sps:$4 sm:$0xff] (!%p4248_p5)   ;;  %3005 = vmatprep.subr.bf16.mxu0 (!%p4248_p5), %v4979_v27  ;;  %v4982_v18 = vld [vmem:[%s6576_s6 + $0x84] ss:$8 sps:$4 sm:$0xff] (!%p4248_p5)  }
 0x291   : > { %v1729_v20 = vpop.f32.mrb[7].mxu1  ;;  %3006 = vmatpush1.bf16.msra.mxu0 (!%p4248_p5), %v4981_v17  ;;  %v4985_v31 = vld [vmem:[%s6576_s6 + $0x94] ss:$8 sps:$4 sm:$0xff] (!%p4248_p5)   ;;  %v4987_v19 = vld [vmem:[%s6576_s6 + $0x90] ss:$8 sps:$4 sm:$0xff] (!%p4248_p5)  }
 0x292   : > { %3007 = vmatprep.subr.bf16.mxu0 (!%p4248_p5), %v4982_v18  ;;  %v4988_v32 = vld [vmem:[%s6576_s6 + $0xa4] ss:$8 sps:$4 sm:$0xff] (!%p4248_p5)   ;;  %v4990_v20 = vld [vmem:[%s6576_s6 + $0xa0] ss:$8 sps:$4 sm:$0xff] (!%p4248_p5)  }
 0x293   : > { %v5030_v27 = vld [vmem:[%s6576_s6 + $0x180] ss:$8 sps:$4 sm:$0xff] (!%p4248_p5)   ;;  %v5038_v17 = vld [vmem:[%s6576_s6 + $0x1a4] ss:$8 sps:$4 sm:$0xff] (!%p4248_p5)  }
 0x294   : > { %v5036_v18 = vld [vmem:[%s6576_s6 + $0x1a0] ss:$8 sps:$4 sm:$0xff] (!%p4248_p5)  }
 0x2cd   : > { %v2419_v33 = vpop.f32.mrb[8].mxu0 }
 0x2ce   : > { %v2460_v34 = vpop.f32.mrb[8].mxu1  ;;  %v2420_v35 = vadd.f32 %v2419_v33, %v1643_v7  ;;  %v2421_v36 = vpop.f32.mrb[9].mxu0  ;;  %v2577_v7 = vsub.s32 (!%p4248_p5), 2, %v6321_v13  ;;  %v4991_v33 = vld [vmem:[%s6576_s6 + $0xb4] ss:$8 sps:$4 sm:$0xff] (!%p4248_p5)  }
 0x2cf   : > { %v2462_v37 = vpop.f32.mrb[9].mxu1  ;;  %v2422_v39 = vadd.f32 %v2421_v36, %v1645_v16  ;;  %v2423_v40 = vpop.f32.mrb[10].mxu0  ;;  %v5054_v36 = vld [vmem:[#allocation10 + $0x4] ss:$8 sps:$4 sm:$0xff] (!%p4248_p5)  }
 0x2d0   : > { %v2464_v41 = vpop.f32.mrb[10].mxu1  ;;  %v2461_v42 = vadd.f32 %v2460_v34, %v2420_v35  ;;  %v2424_v44 = vpop.f32.mrb[11].mxu0  ;;  %v6344_v25 = vrot.slane (!%p4248_p5), %v6339_v23, %v2577_v7  ;;  %v4993_v34 = vld [vmem:[%s6576_s6 + $0xb0] ss:$8 sps:$4 sm:$0xff] (!%p4248_p5)   ;;  %v4994_v35 = vld [vmem:[%s6576_s6 + $0xc4] ss:$8 sps:$4 sm:$0xff] (!%p4248_p5)   ;;  %3293 = vmatprep.subr.bf16.mxu1 (!%p4248_p5), %v5054_v36 }
 0x2d1   : > { %v2465_v45 = vpop.f32.mrb[11].mxu1  ;;  %v2463_v46 = vadd.f32 %v2462_v37, %v2422_v39  ;;  %v5056_v37 = vld [vmem:[#allocation10] ss:$8 sps:$4 sm:$0xff] (!%p4248_p5)   ;;  %v5057_v39 = vld [vmem:[#allocation10 + $0x14] ss:$8 sps:$4 sm:$0xff] (!%p4248_p5)   ;;  %v6392_v44 = vsub.s32 (!%p4248_p5), 0, %v6321_v13 }
 0x2d2   : > { %v2549_v47 = vadd.f32 %v2461_v42, %v649_v38  ;;  %v4996_v38 = vld [vmem:[%s6576_s6 + $0xc0] ss:$8 sps:$4 sm:$0xff] (!%p4248_p5)   ;;  %v4997_v40 = vld [vmem:[%s6576_s6 + $0xd4] ss:$8 sps:$4 sm:$0xff] (!%p4248_p5)   ;;  %3294 = vmatpush1.bf16.msra.mxu1 (!%p4248_p5), %v5056_v37  ;;  %v5000_v45 = vld [vmem:[%s6576_s6 + $0xe4] ss:$8 sps:$4 sm:$0xff] (!%p4248_p5)  }
 0x2d3   : > { %v2550_v48 = vadd.f32 %v2463_v46, %v650_v43  ;;  %v5059_v41 = vld [vmem:[#allocation10 + $0x10] ss:$8 sps:$4 sm:$0xff] (!%p4248_p5)   ;;  %3295 = vmatprep.subr.bf16.mxu1 (!%p4248_p5), %v5057_v39  ;;  %v5060_v42 = vld [vmem:[#allocation10 + $0x24] ss:$8 sps:$4 sm:$0xff] (!%p4248_p5)   ;;  %v2581_v46 = vsub.s32 (!%p4248_p5), 3, %v6321_v13 }
 0x2d4   : > { %2553 = vst [vmem:[#allocation2] sm:$0xff] %v2549_v47  ;;  %v4999_v43 = vld [vmem:[%s6576_s6 + $0xd0] ss:$8 sps:$4 sm:$0xff] (!%p4248_p5)   ;;  %v5023_v7 = vld [vmem:[%s6576_s6 + $0x154] ss:$8 sps:$4 sm:$0xff] (!%p4248_p5)  }
 0x2d5   : > { %2554 = vst [vmem:[#allocation2 + $0x8] sm:$0xff] %v2550_v48  ;;  %v5062_v47 = vld [vmem:[#allocation10 + $0x20] ss:$8 sps:$4 sm:$0xff] (!%p4248_p5)   ;;  %v5053_v37 = vld [vmem:[%s6576_s6 + $0x1f4] ss:$8 sps:$4 sm:$0xff] (!%p4248_p5)  }
 0x2d6   : > { %3296 = vmatpush1.bf16.msra.mxu1 (!%p4248_p5), %v5059_v41  ;;  %v5002_v48 = vld [vmem:[%s6576_s6 + $0xe0] ss:$8 sps:$4 sm:$0xff] (!%p4248_p5)   ;;  %v5015_v13 = vld [vmem:[%s6576_s6 + $0x130] ss:$8 sps:$4 sm:$0xff] (!%p4248_p5)  }
 0x2d7   : > { %3297 = vmatprep.subr.bf16.mxu1 (!%p4248_p5), %v5060_v42  ;;  %v5051_v39 = vld [vmem:[%s6576_s6 + $0x1f0] ss:$8 sps:$4 sm:$0xff] (!%p4248_p5)  }
 0x2d8   : > { %v5077_v41 = vld [vmem:[#allocation10 + $0x70] ss:$8 sps:$4 sm:$0xff] (!%p4248_p5)   ;;  %v5078_v42 = vld [vmem:[#allocation10 + $0x84] ss:$8 sps:$4 sm:$0xff] (!%p4248_p5)  }
 0x2da   : > { %3298 = vmatpush1.bf16.msra.mxu1 (!%p4248_p5), %v5062_v47  ;;  %v5086_v47 = vld [vmem:[#allocation10 + $0xa0] ss:$8 sps:$4 sm:$0xff] (!%p4248_p5)  }
 0x2dc   : > { %v2562_v16 = vld [vmem:[#allocation2 + $0x8] sm:$0xff] (!%p4248_p5) }
 0x2dd   : > { %v2588_v28 = vadd.f32 (!%p4248_p5), %v2574_v24, %v2562_v16  ;;  %v5024_v16 = vld [vmem:[%s6576_s6 + $0x160] ss:$8 sps:$4 sm:$0xff] (!%p4248_p5)   ;;  %v5027_v24 = vld [vmem:[%s6576_s6 + $0x170] ss:$8 sps:$4 sm:$0xff] (!%p4248_p5)  }
 0x30d   : > { %v2501_v49 = vpop.f32.mrb[12].mxu0 }
 0x30e   : > { %v2542_v50 = vpop.f32.mrb[12].mxu1  ;;  %v2502_v51 = vadd.f32 %v2501_v49, %v1725_v29  ;;  %v2503_v52 = vpop.f32.mrb[13].mxu0  ;;  %v2592_v29 = vpack.c.bf16 (!%p4248_p5), %v2588_v28, %v2588_v28  ;;  %v2561_v49 = vld [vmem:[#allocation2] sm:$0xff] (!%p4248_p5)  ;;  %v5035_v28 = vld [vmem:[%s6576_s6 + $0x194] ss:$8 sps:$4 sm:$0xff] (!%p4248_p5)  }
 0x30f   : > { %v2544_v53 = vpop.f32.mrb[13].mxu1  ;;  %v2504_v55 = vadd.f32 %v2503_v52, %v1727_v30  ;;  %v2505_v56 = vpop.f32.mrb[14].mxu0  ;;  %2560 = sbr.rel (%p4248_p5) target bundleno = 1835 (0x72b), region = 120  ;;  %v4984_v30 = vld [vmem:[%s6576_s6 + $0x80] ss:$8 sps:$4 sm:$0xff] (!%p4248_p5)   ;;  %v2570_v52 = vrot.slane (!%p4248_p5), %v6339_v23, %v6392_v44 }
 0x310   : > { %v2546_v57 = vpop.f32.mrb[14].mxu1  ;;  %v2543_v58 = vadd.f32 %v2542_v50, %v2502_v51  ;;  %v2506_v60 = vpop.f32.mrb[15].mxu0  ;;  %3023 = vmatprep.mubr.bf16.mxu0 (!%p4248_p5), %v2592_v29  ;;  %3008 = vmatpush1.bf16.msra.mxu0 (!%p4248_p5), %v4984_v30  ;;  %v5063_v50 = vld [vmem:[#allocation10 + $0x34] ss:$8 sps:$4 sm:$0xff] (!%p4248_p5)   ;;  %v5066_v56 = vld [vmem:[#allocation10 + $0x44] ss:$8 sps:$4 sm:$0xff] (!%p4248_p5)  }
 0x311   : > { %v2547_v61 = vpop.f32.mrb[15].mxu1  ;;  %v2545_v62 = vadd.f32 %v2544_v53, %v2504_v55  ;;  %3009 = vmatprep.subr.bf16.mxu0 (!%p4248_p5), %v4985_v31  ;;  %v5003_v51 = vld [vmem:[%s6576_s6 + $0xf4] ss:$8 sps:$4 sm:$0xff] (!%p4248_p5)   ;;  %v2582_v55 = vrot.slane (!%p4248_p5), %v6339_v23, %v2581_v46  ;;  %v5005_v57 = vld [vmem:[%s6576_s6 + $0xf0] ss:$8 sps:$4 sm:$0xff] (!%p4248_p5)   ;;  %3299 = vmatprep.subr.bf16.mxu1 (!%p4248_p5), %v5063_v50 }
 0x312   : > { %v2551_v63 = vadd.f32 %v2543_v58, %v651_v54  ;;  %v5065_v54 = vld [vmem:[#allocation10 + $0x30] ss:$8 sps:$4 sm:$0xff] (!%p4248_p5)   ;;  %v5008_v58 = vld [vmem:[%s6576_s6 + $0x104] ss:$8 sps:$4 sm:$0xff] (!%p4248_p5)  }
 0x313   : > { %v2552_v0 = vadd.f32 %v2545_v62, %v652_v59  ;;  %v2587_v59 = vadd.f32 (!%p4248_p5), %v2570_v52, %v2561_v49  ;;  %v5068_v60 = vld [vmem:[#allocation10 + $0x40] ss:$8 sps:$4 sm:$0xff] (!%p4248_p5)   ;;  %v5069_v62 = vld [vmem:[#allocation10 + $0x54] ss:$8 sps:$4 sm:$0xff] (!%p4248_p5)   ;;  %3300 = vmatpush1.bf16.msra.mxu1 (!%p4248_p5), %v5065_v54  ;;  %v5083_v46 = vld [vmem:[#allocation10 + $0x90] ss:$8 sps:$4 sm:$0xff] (!%p4248_p5)  }
 0x314   : > { %2555 = vst [vmem:[#allocation2 + $0x10] sm:$0xff] %v2551_v63  ;;  %3010 = vmatpush1.bf16.msra.mxu0 (!%p4248_p5), %v4987_v19  ;;  %v5006_v63 = vld [vmem:[%s6576_s6 + $0x100] ss:$8 sps:$4 sm:$0xff] (!%p4248_p5)   ;;  %3301 = vmatprep.subr.bf16.mxu1 (!%p4248_p5), %v5066_v56  ;;  %v5029_v23 = vld [vmem:[%s6576_s6 + $0x174] ss:$8 sps:$4 sm:$0xff] (!%p4248_p5)  }
 0x315   : > { %2556 = vst [vmem:[#allocation2 + $0x18] sm:$0xff] %v2552_v0  ;;  %3011 = vmatprep.subr.bf16.mxu0 (!%p4248_p5), %v4988_v32  ;;  %v2591_v0 = vpack.c.bf16 (!%p4248_p5), %v2587_v59, %v2587_v59  ;;  %v5033_v29 = vld [vmem:[%s6576_s6 + $0x190] ss:$8 sps:$4 sm:$0xff] (!%p4248_p5)   ;;  %v5041_v30 = vld [vmem:[%s6576_s6 + $0x1b4] ss:$8 sps:$4 sm:$0xff] (!%p4248_p5)  }
 0x316   : > { %v5039_v31 = vld [vmem:[%s6576_s6 + $0x1b0] ss:$8 sps:$4 sm:$0xff]   ;;  %v5044_v19 = vld [vmem:[%s6576_s6 + $0x1c4] ss:$8 sps:$4 sm:$0xff]   ;;  %v5042_v32 = vld [vmem:[%s6576_s6 + $0x1c0] ss:$8 sps:$4 sm:$0xff]  }
 0x317   : > { %3302 = vmatpush1.bf16.msra.mxu1 %v5068_v60  ;;  %v5089_v49 = vld [vmem:[#allocation10 + $0xb0] ss:$8 sps:$4 sm:$0xff]   ;;  %v5090_v50 = vld [vmem:[#allocation10 + $0xc4] ss:$8 sps:$4 sm:$0xff]   ;;  %v5093_v52 = vld [vmem:[#allocation10 + $0xd4] ss:$8 sps:$4 sm:$0xff]  }
 0x318   : > { %3012 = vmatpush1.bf16.msra.mxu0 %v4990_v20  ;;  %3303 = vmatprep.subr.bf16.mxu1 %v5069_v62  ;;  %v5047_v20 = vld [vmem:[%s6576_s6 + $0x1d4] ss:$8 sps:$4 sm:$0xff]   ;;  %v2659_v59 = vld [vmem:[#allocation8] sm:$0x3] }
 0x319   : > { %3013 = vmatprep.subr.bf16.mxu0 %v4991_v33  ;;  %v5045_v33 = vld [vmem:[%s6576_s6 + $0x1d0] ss:$8 sps:$4 sm:$0xff]   ;;  %v2664_v60 = vrot.slane %v2659_v59, %v6392_v44 }
 0x31a   : > { %v5096_v54 = vld [vmem:[#allocation10 + $0xe4] ss:$8 sps:$4 sm:$0xff]   ;;  %v5099_v56 = vld [vmem:[#allocation10 + $0xf4] ss:$8 sps:$4 sm:$0xff]  }
 0x31b   : > { %3304 = vmatpush1.bf16.msra.mxu1 %v5071_v2  ;;  %v2563_v36 = vld [vmem:[#allocation2 + $0x10] sm:$0xff] }
 0x31c   : > { %3014 = vmatpush1.bf16.msra.mxu0 %v4993_v34  ;;  %v2564_v53 = vld [vmem:[#allocation2 + $0x18] sm:$0xff]  ;;  %3305 = vmatprep.subr.bf16.mxu1 %v5072_v4  ;;  %v5050_v34 = vld [vmem:[%s6576_s6 + $0x1e4] ss:$8 sps:$4 sm:$0xff]  }
 0x31d   : > { %3015 = vmatprep.subr.bf16.mxu0 %v4994_v35  ;;  %v2590_v61 = vadd.f32 %v2582_v55, %v2564_v53  ;;  %v5048_v35 = vld [vmem:[%s6576_s6 + $0x1e0] ss:$8 sps:$4 sm:$0xff]  }
 0x31e   : > { %v5095_v53 = vld [vmem:[#allocation10 + $0xd0] ss:$8 sps:$4 sm:$0xff]   ;;  %v5098_v55 = vld [vmem:[#allocation10 + $0xe0] ss:$8 sps:$4 sm:$0xff]  }
 0x31f   : > { %v2594_v3 = vpack.c.bf16 %v2590_v61, %v2590_v61  ;;  %3306 = vmatpush1.bf16.msra.mxu1 %v5074_v9  ;;  %v2668_v61 = vrot.slane %v2659_v59, %v6330_v22 }
 0x320   : > { %3016 = vmatpush1.bf16.msra.mxu0 %v4996_v38  ;;  %3307 = vmatprep.subr.bf16.mxu1 %v5075_v10  ;;  %v2589_v38 = vadd.f32 %v6344_v25, %v2563_v36  ;;  %v5084_v25 = vld [vmem:[#allocation10 + $0xa4] ss:$8 sps:$4 sm:$0xff]   ;;  %v5129_v36 = vld [vmem:[#allocation13 + $0x90] ss:$8 sps:$4 sm:$0xff]  }
 0x321   : > { %3017 = vmatprep.subr.bf16.mxu0 %v4997_v40 }
 0x322   : > { %v2593_v40 = vpack.c.bf16 %v2589_v38, %v2589_v38  ;;  %v5132_v38 = vld [vmem:[#allocation13 + $0xa0] ss:$8 sps:$4 sm:$0xff]  }
 0x323   : > { %3308 = vmatpush1.bf16.msra.mxu1 %v5077_v41  ;;  %v5140_v41 = vld [vmem:[#allocation13 + $0xc4] ss:$8 sps:$4 sm:$0xff]  }
 0x324   : > { %3018 = vmatpush1.bf16.msra.mxu0 %v4999_v43  ;;  %v5080_v43 = vld [vmem:[#allocation10 + $0x80] ss:$8 sps:$4 sm:$0xff]   ;;  %3309 = vmatprep.subr.bf16.mxu1 %v5078_v42 }
 0x325   : > { %3019 = vmatprep.subr.bf16.mxu0 %v5000_v45  ;;  %v5081_v45 = vld [vmem:[#allocation10 + $0x94] ss:$8 sps:$4 sm:$0xff]   ;;  %v5138_v42 = vld [vmem:[#allocation13 + $0xc0] ss:$8 sps:$4 sm:$0xff]  }
 0x327   : > { %3310 = vmatpush1.bf16.msra.mxu1 %v5080_v43  ;;  %v5143_v43 = vld [vmem:[#allocation13 + $0xd4] ss:$8 sps:$4 sm:$0xff]  }
 0x328   : > { %3020 = vmatpush1.bf16.msra.mxu0 %v5002_v48  ;;  %3311 = vmatprep.subr.bf16.mxu1 %v5081_v45  ;;  %v5087_v48 = vld [vmem:[#allocation10 + $0xb4] ss:$8 sps:$4 sm:$0xff]  }
 0x329   : > { %3021 = vmatprep.subr.bf16.mxu0 %v5003_v51  ;;  %v5092_v51 = vld [vmem:[#allocation10 + $0xc0] ss:$8 sps:$4 sm:$0xff]   ;;  %v5141_v45 = vld [vmem:[#allocation13 + $0xd0] ss:$8 sps:$4 sm:$0xff]  }
 0x32b   : > { %3312 = vmatpush1.bf16.msra.mxu1 %v5083_v46  ;;  %v5146_v46 = vld [vmem:[#allocation13 + $0xe4] ss:$8 sps:$4 sm:$0xff]  }
 0x32c   : > { %3022 = vmatpush1.bf16.msra.mxu0 %v5005_v57  ;;  %3313 = vmatprep.subr.bf16.mxu1 %v5084_v25  ;;  %v5101_v57 = vld [vmem:[#allocation10 + $0xf0] ss:$8 sps:$4 sm:$0xff]   ;;  %v5144_v25 = vld [vmem:[#allocation13 + $0xe0] ss:$8 sps:$4 sm:$0xff]  }
 0x32d   : > { %3032 = vmatprep.subr.bf16.mxu0 %v5008_v58  ;;  %v5104_v58 = vld [vmem:[#allocation13 + $0x4] ss:$8 sps:$4 sm:$0xff]  }
 0x32f   : > { %3024 = vmatmul.mubr.bf16.vlgmr.msra.gmra.mrb[0].mxu0 %v2591_v0  ;;  %3314 = vmatpush1.bf16.msra.mxu1 %v5086_v47  ;;  %v5149_v47 = vld [vmem:[#allocation13 + $0xf4] ss:$8 sps:$4 sm:$0xff]  }
 0x330   : > { %3033 = vmatpush1.bf16.msra.mxu0 %v5006_v63  ;;  %3064 = vmatprep.mubr.bf16.mxu0 %v2594_v3 }
 0x331   : > { %3034 = vmatprep.subr.bf16.mxu0 %v5011_v1  ;;  %3315 = vmatprep.subr.bf16.mxu1 %v5087_v48  ;;  %v5147_v48 = vld [vmem:[#allocation13 + $0xf0] ss:$8 sps:$4 sm:$0xff]  }
 0x333   : > { %3316 = vmatpush1.bf16.msra.mxu1 %v5089_v49  ;;  %v3121_v49 = vld [vmem:[#allocation11] sm:$0x3] }
 0x334   : > { %3035 = vmatpush1.bf16.msra.mxu0 %v5009_v5  ;;  %3317 = vmatprep.subr.bf16.mxu1 %v5090_v50  ;;  %v3126_v50 = vrot.slane %v3121_v49, %v6392_v44 }
 0x335   : > { %3036 = vmatprep.subr.bf16.mxu0 %v5014_v6 }
 0x337   : > { %3318 = vmatpush1.bf16.msra.mxu1 %v5092_v51  ;;  %v3130_v51 = vrot.slane %v3121_v49, %v6330_v22 }
 0x338   : > { %3037 = vmatpush1.bf16.msra.mxu0 %v5012_v11  ;;  %3319 = vmatprep.subr.bf16.mxu1 %v5093_v52 }
 0x339   : > { %3038 = vmatprep.subr.bf16.mxu0 %v5017_v12 }
 0x33b   : > { %3320 = vmatpush1.bf16.msra.mxu1 %v5095_v53 }
 0x33c   : > { %3039 = vmatpush1.bf16.msra.mxu0 %v5015_v13  ;;  %3321 = vmatprep.subr.bf16.mxu1 %v5096_v54 }
 0x33d   : > { %3040 = vmatprep.subr.bf16.mxu0 %v5020_v14 }
 0x33f   : > { %3322 = vmatpush1.bf16.msra.mxu1 %v5098_v55 }
 0x340   : > { %3041 = vmatpush1.bf16.msra.mxu0 %v5018_v21  ;;  %3323 = vmatprep.subr.bf16.mxu1 %v5099_v56 }
 0x341   : > { %3042 = vmatprep.subr.bf16.mxu0 %v5023_v7 }
 0x343   : > { %3324 = vmatpush1.bf16.msra.mxu1 %v5101_v57 }
 0x344   : > { %3043 = vmatpush1.bf16.msra.mxu0 %v5021_v8  ;;  %3554 = vmatprep.subr.bf16.mxu1 %v5104_v58  ;;  %v5102_v8 = vld [vmem:[#allocation13] ss:$8 sps:$4 sm:$0xff]  }
 0x345   : > { %3044 = vmatprep.subr.bf16.mxu0 %v5026_v15 }
 0x348   : > { %3045 = vmatpush1.bf16.msra.mxu0 %v5024_v16  ;;  %v5107_v16 = vld [vmem:[#allocation13 + $0x14] ss:$8 sps:$4 sm:$0xff]  }
 0x349   : > { %3046 = vmatprep.subr.bf16.mxu0 %v5029_v23  ;;  %v5105_v23 = vld [vmem:[#allocation13 + $0x10] ss:$8 sps:$4 sm:$0xff]  }
 0x34c   : > { %3047 = vmatpush1.bf16.msra.mxu0 %v5027_v24  ;;  %v5110_v24 = vld [vmem:[#allocation13 + $0x24] ss:$8 sps:$4 sm:$0xff]  }
 0x34d   : > { %3048 = vmatprep.subr.bf16.mxu0 %v5032_v26  ;;  %v5108_v26 = vld [vmem:[#allocation13 + $0x20] ss:$8 sps:$4 sm:$0xff]  }
 0x350   : > { %3049 = vmatpush1.bf16.msra.mxu0 %v5030_v27  ;;  %v5113_v27 = vld [vmem:[#allocation13 + $0x34] ss:$8 sps:$4 sm:$0xff]  }
 0x351   : > { %3050 = vmatprep.subr.bf16.mxu0 %v5035_v28  ;;  %v5111_v28 = vld [vmem:[#allocation13 + $0x30] ss:$8 sps:$4 sm:$0xff]  }
 0x354   : > { %3051 = vmatpush1.bf16.msra.mxu0 %v5033_v29  ;;  %v5116_v29 = vld [vmem:[#allocation13 + $0x44] ss:$8 sps:$4 sm:$0xff]  }
 0x355   : > { %3052 = vmatprep.subr.bf16.mxu0 %v5038_v17  ;;  %v5114_v17 = vld [vmem:[#allocation13 + $0x40] ss:$8 sps:$4 sm:$0xff]  }
 0x358   : > { %3053 = vmatpush1.bf16.msra.mxu0 %v5036_v18  ;;  %v5119_v18 = vld [vmem:[#allocation13 + $0x54] ss:$8 sps:$4 sm:$0xff]  }
 0x359   : > { %3054 = vmatprep.subr.bf16.mxu0 %v5041_v30  ;;  %v5117_v30 = vld [vmem:[#allocation13 + $0x50] ss:$8 sps:$4 sm:$0xff]  }
 0x35c   : > { %3055 = vmatpush1.bf16.msra.mxu0 %v5039_v31  ;;  %v5122_v31 = vld [vmem:[#allocation13 + $0x64] ss:$8 sps:$4 sm:$0xff]  }
 0x35d   : > { %3056 = vmatprep.subr.bf16.mxu0 %v5044_v19  ;;  %v5120_v19 = vld [vmem:[#allocation13 + $0x60] ss:$8 sps:$4 sm:$0xff]  }
 0x360   : > { %3057 = vmatpush1.bf16.msra.mxu0 %v5042_v32  ;;  %v5125_v32 = vld [vmem:[#allocation13 + $0x74] ss:$8 sps:$4 sm:$0xff]  }
 0x361   : > { %3058 = vmatprep.subr.bf16.mxu0 %v5047_v20  ;;  %v5123_v20 = vld [vmem:[#allocation13 + $0x70] ss:$8 sps:$4 sm:$0xff]  }
 0x364   : > { %3059 = vmatpush1.bf16.msra.mxu0 %v5045_v33  ;;  %v5128_v33 = vld [vmem:[#allocation13 + $0x84] ss:$8 sps:$4 sm:$0xff]  }
 0x365   : > { %3060 = vmatprep.subr.bf16.mxu0 %v5050_v34  ;;  %v5126_v34 = vld [vmem:[#allocation13 + $0x80] ss:$8 sps:$4 sm:$0xff]  }
 0x368   : > { %3061 = vmatpush1.bf16.msra.mxu0 %v5048_v35  ;;  %v5131_v35 = vld [vmem:[#allocation13 + $0x94] ss:$8 sps:$4 sm:$0xff]  }
 0x369   : > { %3062 = vmatprep.subr.bf16.mxu0 %v5053_v37  ;;  %v5134_v37 = vld [vmem:[#allocation13 + $0xa4] ss:$8 sps:$4 sm:$0xff]  }
 0x36c   : > { %3063 = vmatpush1.bf16.msra.mxu0 %v5051_v39  ;;  %v5137_v39 = vld [vmem:[#allocation13 + $0xb4] ss:$8 sps:$4 sm:$0xff]  }
 0x36f   : > { %3065 = vmatmul.mubr.bf16.vlgmr.msra.gmra.mrb[0].mxu0 %v2593_v40  ;;  %v5135_v40 = vld [vmem:[#allocation13 + $0xb0] ss:$8 sps:$4 sm:$0xff]  }
 0x442   : > { %v3066_v62 = vpop.f32.mrb[0].mxu0 }
 0x443   : > { %v4428_v63 = vadd.f32 %v3066_v62, %v2664_v60  ;;  %v3068_v0 = vpop.f32.mrb[1].mxu0 }
 0x444   : > { %v4429_v1 = vadd.f32 %v3068_v0, %v2668_v61  ;;  %v3070_v2 = vpop.f32.mrb[2].mxu0 }
 0x445   : > { %v4313_v3 = vmul.f32 -1.442695, %v4428_v63  ;;  %v3071_v4 = vpop.f32.mrb[3].mxu0 }
 0x446   : > { %v4314_v5 = vmul.f32 -1.442695, %v4429_v1 }
 0x447   : > { %5166 = vpow2.f32 %v4313_v3 }
 0x448   : > { %5168 = vpow2.f32 %v4314_v5 }
 0x451   : > { %v5167_v6 = vpop.eup %5166 }
 0x452   : > { %v5169_v9 = vpop.eup %5168  ;;  %v3079_v10 = vadd.f32 1.0, %v5167_v6  ;;  %v5150_v6 = vld [vmem:[#allocation16 + $0x40] sm:$0xff]  }
 0x453   : > { %v3080_v11 = vadd.f32 1.0, %v5169_v9  ;;  %v5151_v9 = vld [vmem:[#allocation16] sm:$0xff]   ;;  %4406 = vmatprep.subr.bf16.mxu0 %v5150_v6 }
 0x454   : > { %5170 = vrcp.f32 %v3079_v10  ;;  %4407 = vmatpush3.bf16.msra.mxu0 %v5151_v9  ;;  %v5152_v10 = vld [vmem:[#allocation16 + $0x48] sm:$0xff]  }
 0x455   : > { %5172 = vrcp.f32 %v3080_v11  ;;  %v5153_v11 = vld [vmem:[#allocation16 + $0x8] sm:$0xff]   ;;  %4408 = vmatprep.subr.bf16.mxu0 %v5152_v10 }
 0x458   : > { %4409 = vmatpush3.bf16.msra.mxu0 %v5153_v11 }
 0x45e   : > { %v5171_v12 = vpop.eup %5170 }
 0x45f   : > { %v5173_v13 = vpop.eup %5172  ;;  %v3085_v14 = vmul.f32 %v5171_v12, %v4428_v63  ;;  %v5154_v12 = vld [vmem:[#allocation16 + $0x50] sm:$0xff]  }
 0x460   : > { %v3086_v21 = vmul.f32 %v5173_v13, %v4429_v1  ;;  %v5155_v13 = vld [vmem:[#allocation16 + $0x10] sm:$0xff]   ;;  %4410 = vmatprep.subr.bf16.mxu0 %v5154_v12 }
 0x461   : > { %v3087_v15 = vpack.c.bf16 %v3085_v14, %v3085_v14  ;;  %4411 = vmatpush3.bf16.msra.mxu0 %v5155_v13  ;;  %v5156_v14 = vld [vmem:[#allocation16 + $0x58] sm:$0xff]  }
 0x462   : > { %v3088_v7 = vpack.c.bf16 %v3086_v21, %v3086_v21  ;;  %v5157_v21 = vld [vmem:[#allocation16 + $0x18] sm:$0xff]   ;;  %4412 = vmatprep.subr.bf16.mxu0 %v5156_v14 }
 0x464   : > { %3325 = vmatprep.mubr.bf16.mxu1 %v3088_v7  ;;  %v5158_v7 = vld [vmem:[#allocation16 + $0x60] sm:$0xff]  }
 0x465   : > { %3326 = vmatmul.mubr.bf16.vlgmr.msra.gmra.mrb[0].mxu1 %v3087_v15  ;;  %4413 = vmatpush3.bf16.msra.mxu0 %v5157_v21  ;;  %v5160_v15 = vld [vmem:[#allocation16 + $0x68] sm:$0xff]  }
 0x466   : > { %3555 = vmatpush1.bf16.msra.mxu1 %v5102_v8  ;;  %v5159_v8 = vld [vmem:[#allocation16 + $0x20] sm:$0xff]   ;;  %4414 = vmatprep.subr.bf16.mxu0 %v5158_v7 }
 0x467   : > { %3556 = vmatprep.subr.bf16.mxu1 %v5107_v16  ;;  %v5161_v16 = vld [vmem:[#allocation16 + $0x28] sm:$0xff]  }
 0x469   : > { %4415 = vmatpush3.bf16.msra.mxu0 %v5159_v8 }
 0x46a   : > { %3557 = vmatpush1.bf16.msra.mxu1 %v5105_v23  ;;  %4416 = vmatprep.subr.bf16.mxu0 %v5160_v15  ;;  %v5162_v23 = vld [vmem:[#allocation16 + $0x70] sm:$0xff]  }
 0x46b   : > { %3558 = vmatprep.subr.bf16.mxu1 %v5110_v24  ;;  %v5163_v24 = vld [vmem:[#allocation16 + $0x30] sm:$0xff]  }
 0x46d   : > { %4417 = vmatpush3.bf16.msra.mxu0 %v5161_v16 }
 0x46e   : > { %3559 = vmatpush1.bf16.msra.mxu1 %v5108_v26  ;;  %4418 = vmatprep.subr.bf16.mxu0 %v5162_v23  ;;  %v5164_v26 = vld [vmem:[#allocation16 + $0x78] sm:$0xff]  }
 0x46f   : > { %3560 = vmatprep.subr.bf16.mxu1 %v5113_v27  ;;  %v5165_v27 = vld [vmem:[#allocation16 + $0x38] sm:$0xff]  }
 0x471   : > { %4419 = vmatpush3.bf16.msra.mxu0 %v5163_v24 }
 0x472   : > { %3561 = vmatpush1.bf16.msra.mxu1 %v5111_v28  ;;  %4420 = vmatprep.subr.bf16.mxu0 %v5164_v26  ;;  %v3382_v28 = vld [vmem:[#allocation14] sm:$0x3] }
 0x473   : > { %3562 = vmatprep.subr.bf16.mxu1 %v5116_v29  ;;  %v3387_v29 = vrot.slane %v3382_v28, %v6392_v44 }
 0x475   : > { %4421 = vmatpush3.bf16.msra.mxu0 %v5165_v27 }
 0x476   : > { %3563 = vmatpush1.bf16.msra.mxu1 %v5114_v17  ;;  %v3391_v17 = vrot.slane %v3382_v28, %v6330_v22 }
 0x477   : > { %3564 = vmatprep.subr.bf16.mxu1 %v5119_v18 }
 0x47a   : > { %3565 = vmatpush1.bf16.msra.mxu1 %v5117_v30 }
 0x47b   : > { %3566 = vmatprep.subr.bf16.mxu1 %v5122_v31 }
 0x47e   : > { %3567 = vmatpush1.bf16.msra.mxu1 %v5120_v19 }
 0x47f   : > { %3568 = vmatprep.subr.bf16.mxu1 %v5125_v32 }
 0x482   : > { %3569 = vmatpush1.bf16.msra.mxu1 %v5123_v20 }
 0x483   : > { %3570 = vmatprep.subr.bf16.mxu1 %v5128_v33 }
 0x486   : > { %3571 = vmatpush1.bf16.msra.mxu1 %v5126_v34 }
 0x487   : > { %3572 = vmatprep.subr.bf16.mxu1 %v5131_v35 }
 0x48a   : > { %3573 = vmatpush1.bf16.msra.mxu1 %v5129_v36 }
 0x48b   : > { %3574 = vmatprep.subr.bf16.mxu1 %v5134_v37 }
 0x48e   : > { %3575 = vmatpush1.bf16.msra.mxu1 %v5132_v38 }
 0x48f   : > { %3576 = vmatprep.subr.bf16.mxu1 %v5137_v39 }
 0x492   : > { %3577 = vmatpush1.bf16.msra.mxu1 %v5135_v40 }
 0x493   : > { %3578 = vmatprep.subr.bf16.mxu1 %v5140_v41 }
 0x496   : > { %3579 = vmatpush1.bf16.msra.mxu1 %v5138_v42 }
 0x497   : > { %3580 = vmatprep.subr.bf16.mxu1 %v5143_v43 }
 0x49a   : > { %3581 = vmatpush1.bf16.msra.mxu1 %v5141_v45  ;;  %v4383_v45 = vld [vmem:[#allocation17] ss:$0 sm:$0xff] }
 0x49b   : > { %3582 = vmatprep.subr.bf16.mxu1 %v5146_v46 }
 0x49e   : > { %3583 = vmatpush1.bf16.msra.mxu1 %v5144_v25 }
 0x49f   : > { %3584 = vmatprep.subr.bf16.mxu1 %v5149_v47 }
 0x4a2   : > { %3585 = vmatpush1.bf16.msra.mxu1 %v5147_v48 }
 0x538   : > { %v3327_v52 = vpop.f32.mrb[0].mxu1 }
 0x539   : > { %v3328_v53 = vadd.f32 %v3327_v52, %v3126_v50  ;;  %v3329_v54 = vpop.f32.mrb[1].mxu1 }
 0x53a   : > { %v3330_v55 = vadd.f32 %v3329_v54, %v3130_v51  ;;  %v3331_v56 = vpop.f32.mrb[2].mxu1 }
 0x53b   : > { %v4347_v57 = vmul.f32 -1.442695, %v3328_v53  ;;  %v3332_v58 = vpop.f32.mrb[3].mxu1 }
 0x53c   : > { %v4348_v59 = vmul.f32 -1.442695, %v3330_v55 }
 0x53d   : > { %5174 = vpow2.f32 %v4347_v57 }
 0x53e   : > { %5176 = vpow2.f32 %v4348_v59 }
 0x547   : > { %v5175_v60 = vpop.eup %5174 }
 0x548   : > { %v5177_v61 = vpop.eup %5176  ;;  %v3340_v62 = vadd.f32 1.0, %v5175_v60 }
 0x549   : > { %v3341_v63 = vadd.f32 1.0, %v5177_v61 }
 0x54a   : > { %5178 = vrcp.f32 %v3340_v62 }
 0x54b   : > { %5180 = vrcp.f32 %v3341_v63 }
 0x554   : > { %v5179_v0 = vpop.eup %5178 }
 0x555   : > { %v5181_v1 = vpop.eup %5180  ;;  %v3346_v2 = vmul.f32 %v5179_v0, %v3328_v53 }
 0x556   : > { %v3347_v3 = vmul.f32 %v5181_v1, %v3330_v55 }
 0x557   : > { %v3348_v5 = vpack.c.bf16 %v3346_v2, %v3346_v2 }
 0x558   : > { %v3349_v4 = vpack.c.bf16 %v3347_v3, %v3347_v3 }
 0x55a   : > { %3586 = vmatprep.mubr.bf16.mxu1 %v3349_v4 }
 0x55b   : > { %3587 = vmatmul.mubr.bf16.vlgmr.msra.gmra.mrb[4].mxu1 %v3348_v5 }
 0x62e   : > { %v3588_v18 = vpop.f32.mrb[4].mxu1 }
 0x62f   : > { %v3589_v30 = vadd.f32 %v3588_v18, %v3387_v29  ;;  %v3590_v31 = vpop.f32.mrb[5].mxu1 }
 0x630   : > { %v3591_v19 = vadd.f32 %v3590_v31, %v3391_v17  ;;  %v3592_v32 = vpop.f32.mrb[6].mxu1 }
 0x631   : > { %v4381_v20 = vmul.f32 -1.442695, %v3589_v30  ;;  %v3593_v33 = vpop.f32.mrb[7].mxu1 }
 0x632   : > { %v4382_v34 = vmul.f32 -1.442695, %v3591_v19 }
 0x633   : > { %5182 = vpow2.f32 %v4381_v20 }
 0x634   : > { %5184 = vpow2.f32 %v4382_v34 }
 0x63d   : > { %v5183_v35 = vpop.eup %5182 }
 0x63e   : > { %v5185_v36 = vpop.eup %5184  ;;  %v3601_v37 = vadd.f32 1.0, %v5183_v35 }
 0x63f   : > { %v3602_v38 = vadd.f32 1.0, %v5185_v36 }
 0x640   : > { %5186 = vrcp.f32 %v3601_v37 }
 0x641   : > { %5188 = vrcp.f32 %v3602_v38 }
 0x64a   : > { %v5187_v39 = vpop.eup %5186 }
 0x64b   : > { %v5189_v44 = vpop.eup %5188  ;;  %v3607_v40 = vmul.f32 %v5187_v39, %v3589_v30 }
 0x64c   : > { %v3608_v22 = vmul.f32 %v5189_v44, %v3591_v19 }
 0x64d   : > { %v3609_v42 = vpack.c.bf16 %v3607_v40, %v3607_v40 }
 0x64e   : > { %v3610_v41 = vpack.c.bf16 %v3608_v22, %v3608_v22 }
 0x650   : > { %3778 = vmatprep.mubr.bf16.mxu0 %v3610_v41 }
 0x651   : > { %3779 = vmatmul.mubr.bf16.vlgmr.msra.gmra.mrb[4].mxu0 %v3609_v42 }
 0x724   : > { %v4422_v43 = vpop.f32.mrb[4].mxu0 }
 0x725   : > { %v4423_v46 = vpop.f32.mrb[5].mxu0 }
 0x726   : > { %v4424_v25 = vadd.f32 %v4423_v46, %v4422_v43  ;;  %v4425_v47 = vpop.f32.mrb[6].mxu0 }
 0x727   : > { %v4426_v48 = vpop.f32.mrb[7].mxu0 }
 0x728   : > { %v3781_v49 = vadd.f32 %v4424_v25, %v4383_v45 }
 0x72a   : > { %3786 = vst [vmem:[%s6577_s13] sm:$0xff] %v3781_v49 }
 0x72b PF: > { %p30_p10 = scmp.ge.s32.totalorder %s5835_s18, 4   ;;  %s6578_s25 = smov %s5524_s26 }
 0x72c   : > { %s6579_s26 = smov %s5528_s27  ;;  %s6580_s27 = smov %s5847_s23 }
 0x72d   : > { %s6581_s28 = smov %s5835_s18  ;;  %32 = sbr.rel (!%p30_p10) target bundleno = 17 (0x11), region = 167 }
 0x734   :  { %3798 = vsyncpa [#allocation4], 1 }
 0x735   :  { %3800 = vsyncpa [#allocation4 + $0x1], 1 }
 0x736   :  { %3801 = vsyncpa [#allocation6], 1 }
 0x737   :  { %3803 = vsyncpa [#allocation6 + $0x1], 1 }
 0x738   :  { %3804 = vsyncpa [#allocation9], 1 }
 0x739   :  { %3805 = vsyncpa [#allocation12], 1 }
 0x73a   :  { %3806 = vsyncpa [#allocation15], 1 }
 0x73b   :  { %3807 = vsyncpa [#allocation18], 1 }

</bundles_post_ra>
